<compile_context>
chip_gen: v5e
topology: v5e:2x2
jax: 0.10.0
libtpu: 0.0.40
codegen_flags: <defaults>
</compile_context>

<pallas_src>
import jax
import jax.numpy as jnp
from jax.experimental import pallas as pl
from jax.experimental.pallas import tpu as pltpu

# True layer sizes from the PyTorch module.
D_IN, D1, D2, D3, D_OUT = 768, 500, 300, 156, 2


def _pad_to(n, m):
    return ((n + m - 1) // m) * m


# Padded (lane-aligned) sizes.
P_IN = _pad_to(D_IN, 128)    # 768 (already aligned -> no input padding needed)
P1 = _pad_to(D1, 128)        # 512
P_OUT = _pad_to(D_OUT, 128)  # 128


def _head_kernel(x_ref, w1_ref, b1_ref, w234_ref, b234_ref, out_ref):
    # x block may be bf16 (preferred: half the DMA bytes) or f32.
    x = x_ref[...].astype(jnp.bfloat16)

    # fc1 + ReLU (dropout is identity in eval mode).
    # bf16 MXU inputs, f32 accumulation; elementwise math stays in f32.
    h1 = jnp.dot(x, w1_ref[...], preferred_element_type=jnp.float32) + b1_ref[...]
    h1 = jnp.maximum(h1, 0.0)

    # fc2 @ fc3 @ fc4 pre-folded into a single matmul (exact: no nonlinearity
    # between fc2/fc3/fc4).
    logits = jnp.dot(h1.astype(jnp.bfloat16), w234_ref[...],
                     preferred_element_type=jnp.float32) + b234_ref[...]

    # Softmax over dim=1, restricted to the 2 real output classes
    # (remaining P_OUT-2 lanes are zero padding).
    col = jax.lax.broadcasted_iota(jnp.int32, logits.shape, 1)
    valid = col < D_OUT
    logits = jnp.where(valid, logits, -jnp.inf)
    m = jnp.max(logits, axis=1, keepdims=True)
    e = jnp.where(valid, jnp.exp(logits - m), 0.0)
    probs = e / jnp.sum(e, axis=1, keepdims=True)
    out_ref[...] = probs.astype(out_ref.dtype)


def prepare_params(params):
    """One-time param prep: fold fc2..fc4, pad to lane-aligned shapes, cast
    weights to bf16 (biases kept in f32).  Call once, reuse across calls."""
    w1, b1, w2, b2, w3, b3, w4, b4 = params

    # Fold the linear chain fc2 -> fc3 -> fc4 (algebraically exact, done in f32).
    w234 = w2 @ w3 @ w4                       # [500, 2]
    b234 = b2 @ w3 @ w4 + b3 @ w4 + b4        # [2]

    w1_p = jnp.zeros((P_IN, P1), jnp.bfloat16).at[:, :D1].set(
        w1.astype(jnp.bfloat16))
    b1_p = jnp.zeros((1, P1), jnp.float32).at[:, :D1].set(
        b1[None, :].astype(jnp.float32))
    w234_p = jnp.zeros((P1, P_OUT), jnp.bfloat16).at[:D1, :D_OUT].set(
        w234.astype(jnp.bfloat16))
    b234_p = jnp.zeros((1, P_OUT), jnp.float32).at[:, :D_OUT].set(
        b234[None, :].astype(jnp.float32))
    return (w1_p, b1_p, w234_p, b234_p)


def _choose_tiling(B):
    """Pick batch tile TB (multiple of 8) and the number of grid tiles.

    * B <= 512: one tile covering the (sublane-rounded) batch — single step.
    * B  > 512: ~1024-row tiles, with the tile count rounded up to an EVEN
      number >= 2 so ("parallel",) splits the grid across v7x's two
      TensorCores (harmless on single-TC v5e/v6e)."""
    if B <= 512:
        TB = _pad_to(max(B, 8), 8)
        return TB, pl.cdiv(B, TB)          # grid = 1
    n = pl.cdiv(B, 1024)
    n = max(2, n + (n % 2))                # even, >= 2
    TB = _pad_to(pl.cdiv(B, n), 8)
    return TB, pl.cdiv(B, TB)


def bert_arch_head(cls_hs, prepped_params, out_dtype=None):
    """cls_hs: [B, 768] bf16 (preferred) or f32. Returns probabilities [B, 2].

    No wrapper-side pad/astype copies: x is passed straight to pallas_call and
    ragged batches are handled by the partial last grid block (garbage rows in
    the padded region are computed per-row and never written back)."""
    w1_p, b1_p, w234_p, b234_p = prepped_params
    B = cls_hs.shape[0]
    if out_dtype is None:
        out_dtype = cls_hs.dtype

    TB, n_tiles = _choose_tiling(B)
    grid = (n_tiles,)

    grid_spec = pltpu.PrefetchScalarGridSpec(
        num_scalar_prefetch=0,
        grid=grid,
        in_specs=[
            pl.BlockSpec((TB, D_IN), lambda i: (i, 0)),      # x: tiled on batch
            pl.BlockSpec((P_IN, P1), lambda i: (0, 0)),      # w1: resident
            pl.BlockSpec((1, P1), lambda i: (0, 0)),         # b1: resident
            pl.BlockSpec((P1, P_OUT), lambda i: (0, 0)),     # folded w2@w3@w4
            pl.BlockSpec((1, P_OUT), lambda i: (0, 0)),      # folded bias
        ],
        out_specs=pl.BlockSpec((TB, P_OUT), lambda i: (i, 0)),
    )

    x_bytes = B * D_IN * jnp.dtype(cls_hs.dtype).itemsize
    out_bytes = B * P_OUT * jnp.dtype(out_dtype).itemsize
    bytes_accessed = (x_bytes + w1_p.size * 2 + w234_p.size * 2
                      + b1_p.size * 4 + b234_p.size * 4 + out_bytes)
    cost = pl.CostEstimate(
        flops=2 * B * (P_IN * P1 + P1 * P_OUT),
        transcendentals=B * D_OUT,
        bytes_accessed=bytes_accessed,
    )

    out_padded = pl.pallas_call(
        _head_kernel,
        out_shape=jax.ShapeDtypeStruct((B, P_OUT), out_dtype),
        grid_spec=grid_spec,
        compiler_params=pltpu.CompilerParams(
            dimension_semantics=("parallel",)),  # v7x: batch tiles over 2 TCs
        cost_estimate=cost,
    )(cls_hs, w1_p, b1_p, w234_p, b234_p)

    return out_padded[:, :D_OUT]


def init_params(key):
    """Deterministic small-scale init of fc1..fc4 (PyTorch Linear shapes)."""
    ks = jax.random.split(key, 8)

    def lin(kw, kb, fan_in, fan_out):
        bound = 1.0 / jnp.sqrt(fan_in)
        w = jax.random.uniform(kw, (fan_in, fan_out), jnp.float32, -bound, bound)
        b = jax.random.uniform(kb, (fan_out,), jnp.float32, -bound, bound)
        return w, b

    w1, b1 = lin(ks[0], ks[1], D_IN, D1)
    w2, b2 = lin(ks[2], ks[3], D1, D2)
    w3, b3 = lin(ks[4], ks[5], D2, D3)
    w4, b4 = lin(ks[6], ks[7], D3, D_OUT)
    return (w1, b1, w2, b2, w3, b3, w4, b4)


def reference(cls_hs_f32, params):
    """Pure-f32 reference of the (unfolded) classifier head."""
    w1, b1, w2, b2, w3, b3, w4, b4 = params
    h = jnp.maximum(cls_hs_f32 @ w1 + b1, 0.0)
    h = h @ w2 + b2
    h = h @ w3 + b3
    logits = h @ w4 + b4
    return jax.nn.softmax(logits, axis=1)


def _check(probs, ref, B, atol=3e-2):
    p = probs.astype(jnp.float32)
    assert probs.shape == (B, D_OUT)
    assert bool(jnp.all(jnp.isfinite(p)))
    assert jnp.allclose(jnp.sum(p, axis=1), 1.0, atol=1e-2)
    assert jnp.allclose(p, ref, atol=atol), "mismatch vs reference"


if __name__ == "__main__":
    key = jax.random.PRNGKey(0)
    k_params, k_x = jax.random.split(key)

    params = init_params(k_params)
    prepped = prepare_params(params)   # one-time fold + pad + bf16 cast

    # Case 1: small batch, bf16 activations (what the frozen BERT encoder
    # would hand us) -> bf16 probabilities, half the activation DMA.
    B = 8
    cls_hs = jax.random.normal(k_x, (B, D_IN), jnp.float32).astype(jnp.bfloat16)
    probs = jax.block_until_ready(bert_arch_head(cls_hs, prepped))
    _check(probs, reference(cls_hs.astype(jnp.float32), params), B)

    # Case 2: ragged batch in f32 (legacy dtype path), no wrapper pad copy —
    # the partial last grid block handles B not a multiple of the tile.
    B2 = 20
    cls_hs2 = jax.random.normal(jax.random.PRNGKey(1), (B2, D_IN), jnp.float32)
    probs2 = jax.block_until_ready(bert_arch_head(cls_hs2, prepped))
    _check(probs2, reference(cls_hs2, params), B2)

    # Case 3: multi-tile path (even tile count for v7x dual-TC), ragged, bf16.
    B3 = 600
    cls_hs3 = jax.random.normal(jax.random.PRNGKey(2), (B3, D_IN),
                                jnp.float32).astype(jnp.bfloat16)
    probs3 = jax.block_until_ready(bert_arch_head(cls_hs3, prepped))
    _check(probs3, reference(cls_hs3.astype(jnp.float32), params), B3)

    print("KERNEL_OK")
</pallas_src>

<mosaic_0001>
module attributes {stable_mosaic.version = 11 : i64} {
  func.func @_head_kernel(%arg0: i32, %arg1: memref<8x768xbf16, #tpu.memory_space<vmem>>, %arg2: memref<768x512xbf16, #tpu.memory_space<vmem>>, %arg3: memref<1x512xf32, #tpu.memory_space<vmem>>, %arg4: memref<512x128xbf16, #tpu.memory_space<vmem>>, %arg5: memref<1x128xf32, #tpu.memory_space<vmem>>, %arg6: memref<8x128xbf16, #tpu.memory_space<vmem>>) attributes {dimension_semantics = [#tpu.dimension_semantics<parallel>], iteration_bounds = array<i64: 1>, scalar_prefetch = 0 : i64, scratch_operands = 0 : i64, tpu.core_type = #tpu.core_type<tc>, window_params = [{transform_indices = @transform_0, window_bounds = array<i64: 8, 768>}, {pipeline_mode = #tpu.pipeline_mode<synchronous>, transform_indices = @transform_1, window_bounds = array<i64: 768, 512>}, {pipeline_mode = #tpu.pipeline_mode<synchronous>, transform_indices = @transform_2, window_bounds = array<i64: 1, 512>}, {pipeline_mode = #tpu.pipeline_mode<synchronous>, transform_indices = @transform_3, window_bounds = array<i64: 512, 128>}, {pipeline_mode = #tpu.pipeline_mode<synchronous>, transform_indices = @transform_4, window_bounds = array<i64: 1, 128>}, {transform_indices = @transform_5, window_bounds = array<i64: 8, 128>}]} {
    %c0 = arith.constant 0 : index
    %c0_0 = arith.constant 0 : index
    %0 = vector.load %arg1[%c0, %c0_0] : memref<8x768xbf16, #tpu.memory_space<vmem>>, vector<8x768xbf16>
    %c0_1 = arith.constant 0 : index
    %c0_2 = arith.constant 0 : index
    %1 = vector.load %arg2[%c0_1, %c0_2] : memref<768x512xbf16, #tpu.memory_space<vmem>>, vector<768x512xbf16>
    %cst = arith.constant dense<0.000000e+00> : vector<8x512xf32>
    %2 = tpu.matmul %0, %1, %cst {dimension_numbers = #tpu.dot_dimension_numbers<[1], [0], [0], [1], [0, 0, 1, 1], [], []>} : vector<8x768xbf16>, vector<768x512xbf16>, vector<8x512xf32> -> vector<8x512xf32>
    %c0_3 = arith.constant 0 : index
    %c0_4 = arith.constant 0 : index
    %3 = vector.load %arg3[%c0_3, %c0_4] : memref<1x512xf32, #tpu.memory_space<vmem>>, vector<1x512xf32>
    %4 = vector.broadcast %3 : vector<1x512xf32> to vector<8x512xf32>
    %5 = arith.addf %2, %4 : vector<8x512xf32>
    %cst_5 = arith.constant 0.000000e+00 : f32
    %6 = vector.broadcast %cst_5 : f32 to vector<8x512xf32>
    %7 = arith.maximumf %5, %6 : vector<8x512xf32>
    %8 = arith.truncf %7 : vector<8x512xf32> to vector<8x512xbf16>
    %c0_6 = arith.constant 0 : index
    %c0_7 = arith.constant 0 : index
    %9 = vector.load %arg4[%c0_6, %c0_7] : memref<512x128xbf16, #tpu.memory_space<vmem>>, vector<512x128xbf16>
    %cst_8 = arith.constant dense<0.000000e+00> : vector<8x128xf32>
    %10 = tpu.matmul %8, %9, %cst_8 {dimension_numbers = #tpu.dot_dimension_numbers<[1], [0], [0], [1], [0, 0, 1, 1], [], []>} : vector<8x512xbf16>, vector<512x128xbf16>, vector<8x128xf32> -> vector<8x128xf32>
    %c0_9 = arith.constant 0 : index
    %c0_10 = arith.constant 0 : index
    %11 = vector.load %arg5[%c0_9, %c0_10] : memref<1x128xf32, #tpu.memory_space<vmem>>, vector<1x128xf32>
    %12 = vector.broadcast %11 : vector<1x128xf32> to vector<8x128xf32>
    %13 = arith.addf %10, %12 : vector<8x128xf32>
    %14 = tpu.iota {dimensions = array<i32: 1>} : vector<8x128xi32>
    %c2_i32 = arith.constant 2 : i32
    %15 = vector.broadcast %c2_i32 : i32 to vector<8x128xi32>
    %16 = arith.cmpi slt, %14, %15 : vector<8x128xi32>
    %cst_11 = arith.constant 0xFF800000 : f32
    %17 = vector.broadcast %cst_11 : f32 to vector<8x128xf32>
    %18 = arith.select %16, %13, %17 : vector<8x128xi1>, vector<8x128xf32>
    %cst_12 = arith.constant dense<0xFF800000> : vector<8xf32>
    %19 = vector.multi_reduction <maximumf>, %18, %cst_12 [1] : vector<8x128xf32> to vector<8xf32>
    %20 = vector.shape_cast %19 : vector<8xf32> to vector<8x1xf32>
    %21 = vector.broadcast %20 : vector<8x1xf32> to vector<8x128xf32>
    %22 = arith.subf %18, %21 : vector<8x128xf32>
    %23 = math.exp %22 : vector<8x128xf32>
    %cst_13 = arith.constant 0.000000e+00 : f32
    %24 = vector.broadcast %cst_13 : f32 to vector<8x128xf32>
    %25 = arith.select %16, %23, %24 : vector<8x128xi1>, vector<8x128xf32>
    %cst_14 = arith.constant dense<0.000000e+00> : vector<8xf32>
    %26 = vector.multi_reduction <add>, %25, %cst_14 [1] : vector<8x128xf32> to vector<8xf32>
    %27 = vector.shape_cast %26 : vector<8xf32> to vector<8x1xf32>
    %28 = vector.broadcast %27 : vector<8x1xf32> to vector<8x128xf32>
    %29 = arith.divf %25, %28 : vector<8x128xf32>
    %30 = arith.truncf %29 : vector<8x128xf32> to vector<8x128xbf16>
    %c0_15 = arith.constant 0 : index
    %c0_16 = arith.constant 0 : index
    %31 = vector.load %arg6[%c0_15, %c0_16] : memref<8x128xbf16, #tpu.memory_space<vmem>>, vector<8x128xbf16>
    tpu.vector_store %arg6[%c0_15, %c0_16], %30 {strides = array<i32>} : memref<8x128xbf16, #tpu.memory_space<vmem>>, vector<8x128xbf16>,
    return
  }
  func.func @transform_0(%arg0: i32) -> (i32, i32) {
    %c0_i32 = arith.constant 0 : i32
    %c0_i32_0 = arith.constant 0 : i32
    return %arg0, %c0_i32 : i32, i32
  }
  func.func @transform_1(%arg0: i32) -> (i32, i32) {
    %c0_i32 = arith.constant 0 : i32
    %c0_i32_0 = arith.constant 0 : i32
    %c0_i32_1 = arith.constant 0 : i32
    return %c0_i32, %c0_i32_0 : i32, i32
  }
  func.func @transform_2(%arg0: i32) -> (i32, i32) {
    %c0_i32 = arith.constant 0 : i32
    %c0_i32_0 = arith.constant 0 : i32
    %c0_i32_1 = arith.constant 0 : i32
    return %c0_i32, %c0_i32_0 : i32, i32
  }
  func.func @transform_3(%arg0: i32) -> (i32, i32) {
    %c0_i32 = arith.constant 0 : i32
    %c0_i32_0 = arith.constant 0 : i32
    %c0_i32_1 = arith.constant 0 : i32
    return %c0_i32, %c0_i32_0 : i32, i32
  }
  func.func @transform_4(%arg0: i32) -> (i32, i32) {
    %c0_i32 = arith.constant 0 : i32
    %c0_i32_0 = arith.constant 0 : i32
    %c0_i32_1 = arith.constant 0 : i32
    return %c0_i32, %c0_i32_0 : i32, i32
  }
  func.func @transform_5(%arg0: i32) -> (i32, i32) {
    %c0_i32 = arith.constant 0 : i32
    %c0_i32_0 = arith.constant 0 : i32
    return %arg0, %c0_i32 : i32, i32
  }
}

</mosaic_0001>

<bundles_post_ra>
// kernel: tpu_custom_call.1
= control target key start
LH: loop header
LB: loop body
LE: loop exit
PB: predicated region body
PF: predicated region fallthrough
CT: control target
= control target key end

     0   :  { %10 = vsyncpa [#allocation3], 0  ;;  %s3307_s0 = inlined_call_operand.hbm [shape: bf16[8,768], index: 0, kind: input, shape index: {}]   ;;  %s3308_s1 = inlined_call_operand.hbm [shape: bf16[768,512], index: 1, kind: input, shape index: {}]   ;;  %s3309_s2 = inlined_call_operand.hbm [shape: f32[1,512], index: 2, kind: input, shape index: {}]   ;;  %s3310_s3 = inlined_call_operand.hbm [shape: bf16[512,128], index: 3, kind: input, shape index: {}]   ;;  %s3311_s4 = inlined_call_operand.vmem [shape: f32[1,128], index: 4, kind: input, shape index: {}]   ;;  %s3312_s5 = inlined_call_operand.hbm [shape: bf16[8,128], index: 5, kind: output, shape index: {}]  }
   0x1   :  { %11 = vsyncpa [#allocation6], 0 }
   0x2   :  { %12 = vsyncpa [#allocation9], 0  ;;  %s29_s20 = sshll.u32 %s3308_s1, 4  ;;  %s30_s20 = int_to_ptr.hbm [resolvable:$true] %s29_s20 }
   0x3   :  { %13 = vsyncpa [#allocation4], 0  ;;  %s3208_s21 = smov [#allocation5]   ;;  %s19_s25 = sshll.u32 %s3307_s0, 4  ;;  %s20_s25 = int_to_ptr.hbm [resolvable:$true] %s19_s25 }
   0x4   :  { %s31_s22 = sshll.u32 %s3208_s21, 4  ;;  %s3209_s26 = smov 256   ;;  %s32_s22 = int_to_ptr.vmem [resolvable:$true] %s31_s22 }
   0x5   :  { %s3210_s27 = smov 16   ;;  %s3211_s28 = smov [#allocation2]  }
   0x6   :  { %37 = dma.hbm_to_vmem [thread:$0]  %s30_s20, 24576, %s32_s22, [#allocation6], %s3209_s26, %s3209_s26, %s3210_s27  }
   0x7   :  { %s21_s29 = sshll.u32 %s3211_s28, 4  ;;  %s43_s7 = sshll.u32 %s3309_s2, 4  ;;  %s22_s29 = int_to_ptr.vmem [resolvable:$true] %s21_s29  ;;  %s44_s7 = int_to_ptr.hbm [resolvable:$true] %s43_s7 }
   0x8   :  { %24 = dma.hbm_to_vmem [thread:$0]  %s20_s25, 384, %s22_s29, [#allocation3]  }
   0x9   :  { %s53_s9 = sshll.u32 %s3310_s3, 4  ;;  %s3212_s10 = smov [#allocation7]   ;;  %s54_s9 = int_to_ptr.hbm [resolvable:$true] %s53_s9 }
   0xa   :  { %s45_s11 = sshll.u32 %s3212_s10, 4  ;;  %s3213_s0 = smov [#allocation8]   ;;  %s46_s11 = int_to_ptr.vmem [resolvable:$true] %s45_s11 }
   0xb   :  { %48 = dma.hbm_to_vmem [thread:$0]  %s44_s7, 64, %s46_s11, [#allocation6]  }
   0xc   :  { %s55_s12 = sshll.u32 %s3213_s0, 4  ;;  %s3214_s13 = smov 64   ;;  %s56_s12 = int_to_ptr.vmem [resolvable:$true] %s55_s12 }
   0xd   :  { %s3215_s14 = smov 4  }
   0xe   :  { %61 = dma.hbm_to_vmem [thread:$0]  %s54_s9, 4096, %s56_s12, [#allocation9], %s3214_s13, %s3214_s13, %s3215_s14  }
   0xf   :  { %3200 = dma.done.wait [#allocation3], 384  }
  0x10   :  { %3201 = vsyncadd [#allocation3], 4294966912 }
  0x11   :  { %3202 = dma.done.wait [#allocation6], 24640  }
  0x12   :  { %3203 = vsyncadd [#allocation6], 4294942656 }
  0x13   :  { %3204 = dma.done.wait [#allocation9], 4096  }
  0x14   :  { %3205 = vsyncadd [#allocation9], 4294963200  ;;  %v2060_v0 = vld [vmem:[#allocation5 + $0xe0] sm:$0xf]  ;;  %v2872_v1 = vld [vmem:[#allocation5 + $0xec] sm:$0xf0] }
  0x15   :  { %v2188_v2 = vld [vmem:[#allocation5 + $0x1e0] sm:$0xf]  ;;  %v2061_v3 = vor.u32 %v2872_v1, %v2060_v0  ;;  %v2904_v4 = vld [vmem:[#allocation5 + $0x1ec] sm:$0xf0]  ;;  %s1934_s18 = sshll.u32 %s3312_s5, 4  ;;  %s1935_s18 = int_to_ptr.hbm [resolvable:$true] %s1934_s18 }
  0x16   :  { %v2316_v5 = vld [vmem:[#allocation5 + $0x2e0] sm:$0xf]  ;;  %v2936_v6 = vld [vmem:[#allocation5 + $0x2ec] sm:$0xf0]  ;;  %v2189_v7 = vor.u32 %v2904_v4, %v2188_v2 }
  0x17   :  { %v2317_v8 = vor.u32 %v2936_v6, %v2316_v5  ;;  %v2444_v9 = vld [vmem:[#allocation5 + $0x3e0] sm:$0xf]  ;;  %v2968_v10 = vld [vmem:[#allocation5 + $0x3ec] sm:$0xf0]  ;;  %1266 = vmatpush.bf16.msra.mxu0 %v2061_v3 }
  0x18   :  { %v2044_v11 = vld [vmem:[#allocation5 + $0xc0] sm:$0xf]  ;;  %v2445_v12 = vor.u32 %v2968_v10, %v2444_v9  ;;  %v2868_v13 = vld [vmem:[#allocation5 + $0xcc] sm:$0xf0]  ;;  %1279 = vmatpush.bf16.msra.mxu1 %v2189_v7 }
  0x19   :  { %v2172_v14 = vld [vmem:[#allocation5 + $0x1c0] sm:$0xf]  ;;  %v2900_v15 = vld [vmem:[#allocation5 + $0x1cc] sm:$0xf0]  ;;  %1292 = vmatpush.bf16.msra.mxu2 %v2317_v8  ;;  %v2045_v16 = vor.u32 %v2868_v13, %v2044_v11 }
  0x1a   :  { %v2173_v17 = vor.u32 %v2900_v15, %v2172_v14  ;;  %v2300_v18 = vld [vmem:[#allocation5 + $0x2c0] sm:$0xf]  ;;  %v2932_v19 = vld [vmem:[#allocation5 + $0x2cc] sm:$0xf0]  ;;  %1305 = vmatpush.bf16.msra.mxu3 %v2445_v12 }
  0x1b   :  { %v2428_v20 = vld [vmem:[#allocation5 + $0x3c0] sm:$0xf]  ;;  %v2301_v21 = vor.u32 %v2932_v19, %v2300_v18  ;;  %v2964_v22 = vld [vmem:[#allocation5 + $0x3cc] sm:$0xf0]  ;;  %1267 = vmatpush.bf16.msra.mxu0 %v2045_v16 }
  0x1c   :  { %v2028_v23 = vld [vmem:[#allocation5 + $0xa0] sm:$0xf]  ;;  %v2864_v24 = vld [vmem:[#allocation5 + $0xac] sm:$0xf0]  ;;  %v2429_v25 = vor.u32 %v2964_v22, %v2428_v20  ;;  %1280 = vmatpush.bf16.msra.mxu1 %v2173_v17 }
  0x1d   :  { %v2156_v26 = vld [vmem:[#allocation5 + $0x1a0] sm:$0xf]  ;;  %v2896_v27 = vld [vmem:[#allocation5 + $0x1ac] sm:$0xf0]  ;;  %v2029_v29 = vor.u32 %v2864_v24, %v2028_v23  ;;  %1293 = vmatpush.bf16.msra.mxu2 %v2301_v21 }
  0x1e   :  { %v2284_v28 = vld [vmem:[#allocation5 + $0x2a0] sm:$0xf]  ;;  %v2928_v30 = vld [vmem:[#allocation5 + $0x2ac] sm:$0xf0]  ;;  %v2157_v33 = vor.u32 %v2896_v27, %v2156_v26  ;;  %1306 = vmatpush.bf16.msra.mxu3 %v2429_v25 }
  0x1f   :  { %v2412_v31 = vld [vmem:[#allocation5 + $0x3a0] sm:$0xf]  ;;  %v2960_v32 = vld [vmem:[#allocation5 + $0x3ac] sm:$0xf0]  ;;  %v2285_v34 = vor.u32 %v2928_v30, %v2284_v28  ;;  %1268 = vmatpush.bf16.msra.mxu0 %v2029_v29 }
  0x20   :  { %v2012_v35 = vld [vmem:[#allocation5 + $0x80] sm:$0xf]  ;;  %v2860_v36 = vld [vmem:[#allocation5 + $0x8c] sm:$0xf0]  ;;  %v2413_v38 = vor.u32 %v2960_v32, %v2412_v31  ;;  %1281 = vmatpush.bf16.msra.mxu1 %v2157_v33  ;;  %v2870_v33 = vld [vmem:[#allocation5 + $0xe4] sm:$0xf] }
  0x21   :  { %v2140_v37 = vld [vmem:[#allocation5 + $0x180] sm:$0xf]  ;;  %v2892_v39 = vld [vmem:[#allocation5 + $0x18c] sm:$0xf0]  ;;  %v2013_v44 = vor.u32 %v2860_v36, %v2012_v35  ;;  %1294 = vmatpush.bf16.msra.mxu2 %v2285_v34  ;;  %v2062_v34 = vld [vmem:[#allocation5 + $0xf0] sm:$0xf0] }
  0x22   :  { %v2268_v40 = vld [vmem:[#allocation5 + $0x280] sm:$0xf]  ;;  %v2924_v41 = vld [vmem:[#allocation5 + $0x28c] sm:$0xf0]  ;;  %v2141_v45 = vor.u32 %v2892_v39, %v2140_v37  ;;  %1307 = vmatpush.bf16.msra.mxu3 %v2413_v38  ;;  %v2902_v37 = vld [vmem:[#allocation5 + $0x1e4] sm:$0xf] }
  0x23   :  { %v2396_v42 = vld [vmem:[#allocation5 + $0x380] sm:$0xf]  ;;  %v2956_v43 = vld [vmem:[#allocation5 + $0x38c] sm:$0xf0]  ;;  %v2269_v46 = vor.u32 %v2924_v41, %v2268_v40  ;;  %1269 = vmatpush.bf16.msra.mxu0 %v2013_v44  ;;  %v2190_v38 = vld [vmem:[#allocation5 + $0x1f0] sm:$0xf0] }
  0x24   :  { %v1996_v47 = vld [vmem:[#allocation5 + $0x60] sm:$0xf]  ;;  %v2856_v48 = vld [vmem:[#allocation5 + $0x6c] sm:$0xf0]  ;;  %v2397_v50 = vor.u32 %v2956_v43, %v2396_v42  ;;  %1282 = vmatpush.bf16.msra.mxu1 %v2141_v45  ;;  %v2065_v42 = vor.u32 %v2870_v33, %v2062_v34  ;;  %v2126_v33 = vld [vmem:[#allocation5 + $0x170] sm:$0xf0] }
  0x25   :  { %v2124_v49 = vld [vmem:[#allocation5 + $0x160] sm:$0xf]  ;;  %v2888_v51 = vld [vmem:[#allocation5 + $0x16c] sm:$0xf0]  ;;  %v1997_v56 = vor.u32 %v2856_v48, %v1996_v47  ;;  %1295 = vmatpush.bf16.msra.mxu2 %v2269_v46  ;;  %v2193_v46 = vor.u32 %v2902_v37, %v2190_v38  ;;  %v2866_v48 = vld [vmem:[#allocation5 + $0xc4] sm:$0xf] }
  0x26   :  { %v2252_v52 = vld [vmem:[#allocation5 + $0x260] sm:$0xf]  ;;  %v2920_v53 = vld [vmem:[#allocation5 + $0x26c] sm:$0xf0]  ;;  %v2125_v57 = vor.u32 %v2888_v51, %v2124_v49  ;;  %1308 = vmatpush.bf16.msra.mxu3 %v2397_v50  ;;  %v2046_v49 = vld [vmem:[#allocation5 + $0xd0] sm:$0xf0] }
  0x27   :  { %v2380_v54 = vld [vmem:[#allocation5 + $0x360] sm:$0xf]  ;;  %v2952_v55 = vld [vmem:[#allocation5 + $0x36c] sm:$0xf0]  ;;  %v2253_v58 = vor.u32 %v2920_v53, %v2252_v52  ;;  %1270 = vmatpush.bf16.msra.mxu0 %v1997_v56  ;;  %v2898_v50 = vld [vmem:[#allocation5 + $0x1c4] sm:$0xf] }
  0x28   :  { %v1980_v59 = vld [vmem:[#allocation5 + $0x40] sm:$0xf]  ;;  %v2852_v60 = vld [vmem:[#allocation5 + $0x4c] sm:$0xf0]  ;;  %v2381_v62 = vor.u32 %v2952_v55, %v2380_v54  ;;  %1283 = vmatpush.bf16.msra.mxu1 %v2125_v57  ;;  %v2174_v51 = vld [vmem:[#allocation5 + $0x1d0] sm:$0xf0]  ;;  %v2049_v55 = vor.u32 %v2866_v48, %v2046_v49 }
  0x29   :  { %v2108_v61 = vld [vmem:[#allocation5 + $0x140] sm:$0xf]  ;;  %v2884_v63 = vld [vmem:[#allocation5 + $0x14c] sm:$0xf0]  ;;  %v1981_v4 = vor.u32 %v2852_v60, %v1980_v59  ;;  %1296 = vmatpush.bf16.msra.mxu2 %v2253_v58  ;;  %v2177_v59 = vor.u32 %v2898_v50, %v2174_v51  ;;  %v2862_v60 = vld [vmem:[#allocation5 + $0xa4] sm:$0xf] }
  0x2a   :  { %v2236_v0 = vld [vmem:[#allocation5 + $0x240] sm:$0xf]  ;;  %v2916_v1 = vld [vmem:[#allocation5 + $0x24c] sm:$0xf0]  ;;  %v2109_v5 = vor.u32 %v2884_v63, %v2108_v61  ;;  %1309 = vmatpush.bf16.msra.mxu3 %v2381_v62  ;;  %v2030_v61 = vld [vmem:[#allocation5 + $0xb0] sm:$0xf0] }
  0x2b   :  { %v2364_v2 = vld [vmem:[#allocation5 + $0x340] sm:$0xf]  ;;  %v2948_v3 = vld [vmem:[#allocation5 + $0x34c] sm:$0xf0]  ;;  %v2237_v6 = vor.u32 %v2916_v1, %v2236_v0  ;;  %1271 = vmatpush.bf16.msra.mxu0 %v1981_v4  ;;  %v2894_v62 = vld [vmem:[#allocation5 + $0x1a4] sm:$0xf]  ;;  %v2033_v4 = vor.u32 %v2862_v60, %v2030_v61 }
  0x2c   :  { %v1964_v7 = vld [vmem:[#allocation5 + $0x20] sm:$0xf]  ;;  %v2848_v8 = vld [vmem:[#allocation5 + $0x2c] sm:$0xf0]  ;;  %v2365_v10 = vor.u32 %v2948_v3, %v2364_v2  ;;  %1284 = vmatpush.bf16.msra.mxu1 %v2109_v5  ;;  %v2158_v63 = vld [vmem:[#allocation5 + $0x1b0] sm:$0xf0] }
  0x2d   :  { %v2092_v9 = vld [vmem:[#allocation5 + $0x120] sm:$0xf]  ;;  %v2880_v11 = vld [vmem:[#allocation5 + $0x12c] sm:$0xf0]  ;;  %v1965_v16 = vor.u32 %v2848_v8, %v1964_v7  ;;  %1297 = vmatpush.bf16.msra.mxu2 %v2237_v6  ;;  %v80_v3 = vld [vmem:[#allocation2] sm:$0xff] }
  0x2e   :  { %v2220_v12 = vld [vmem:[#allocation5 + $0x220] sm:$0xf]  ;;  %v2912_v13 = vld [vmem:[#allocation5 + $0x22c] sm:$0xf0]  ;;  %v2093_v19 = vor.u32 %v2880_v11, %v2092_v9  ;;  %1310 = vmatpush.bf16.msra.mxu3 %v2365_v10  ;;  %v288_v9 = vunpack.c.l.b16 %v80_v3  ;;  %v2161_v11 = vor.u32 %v2894_v62, %v2158_v63 }
  0x2f   :  { %v2348_v14 = vld [vmem:[#allocation5 + $0x320] sm:$0xf]  ;;  %v2944_v15 = vld [vmem:[#allocation5 + $0x32c] sm:$0xf0]  ;;  %v2221_v20 = vor.u32 %v2912_v13, %v2220_v12  ;;  %1272 = vmatpush.bf16.msra.mxu0 %v1965_v16  ;;  %v2858_v13 = vld [vmem:[#allocation5 + $0x84] sm:$0xf] }
  0x30   :  { %v1948_v17 = vld [vmem:[#allocation5] sm:$0xf]  ;;  %v2844_v18 = vld [vmem:[#allocation5 + $0xc] sm:$0xf0]  ;;  %v2349_v24 = vor.u32 %v2944_v15, %v2348_v14  ;;  %1285 = vmatpush.bf16.msra.mxu1 %v2093_v19  ;;  %v2014_v14 = vld [vmem:[#allocation5 + $0x90] sm:$0xf0]  ;;  %v289_v15 = vunpack.c.h.b16 %v80_v3  ;;  %v3261_v19 = vpack.c.b16 %v288_v9, %v288_v9 }
  0x31   :  { %v2076_v21 = vld [vmem:[#allocation5 + $0x100] sm:$0xf]  ;;  %v2876_v22 = vld [vmem:[#allocation5 + $0x10c] sm:$0xf0]  ;;  %v1949_v31 = vor.u32 %v2844_v18, %v1948_v17  ;;  %1298 = vmatpush.bf16.msra.mxu2 %v2221_v20  ;;  %v2890_v16 = vld [vmem:[#allocation5 + $0x184] sm:$0xf] }
  0x32   :  { %v2204_v23 = vld [vmem:[#allocation5 + $0x200] sm:$0xf]  ;;  %v2908_v25 = vld [vmem:[#allocation5 + $0x20c] sm:$0xf0]  ;;  %v2077_v35 = vor.u32 %v2876_v22, %v2076_v21  ;;  %1311 = vmatpush.bf16.msra.mxu3 %v2349_v24  ;;  %v2142_v17 = vld [vmem:[#allocation5 + $0x190] sm:$0xf0]  ;;  %v3265_v22 = vpack.c.b16 %v289_v15, %v289_v15  ;;  %v2017_v24 = vor.u32 %v2858_v13, %v2014_v14 }
  0x33   :  { %v2332_v26 = vld [vmem:[#allocation5 + $0x300] sm:$0xf]  ;;  %v2940_v27 = vld [vmem:[#allocation5 + $0x30c] sm:$0xf0]  ;;  %v2205_v36 = vor.u32 %v2908_v25, %v2204_v23  ;;  %1273 = vmatpush.bf16.msra.mxu0 %v1949_v31  ;;  %v1998_v31 = vld [vmem:[#allocation5 + $0x70] sm:$0xf0] }
  0x34   :  { %v2572_v28 = vld [vmem:[#allocation5 + $0x4e0] sm:$0xf]  ;;  %v3000_v29 = vld [vmem:[#allocation5 + $0x4ec] sm:$0xf0]  ;;  %v2333_v39 = vor.u32 %v2940_v27, %v2332_v26  ;;  %1286 = vmatpush.bf16.msra.mxu1 %v2077_v35  ;;  %v2966_v9 = vld [vmem:[#allocation5 + $0x3e4] sm:$0xf] }
  0x35   :  { %v2700_v30 = vld [vmem:[#allocation5 + $0x5e0] sm:$0xf]  ;;  %v3032_v32 = vld [vmem:[#allocation5 + $0x5ec] sm:$0xf0]  ;;  %v2573_v40 = vor.u32 %v3000_v29, %v2572_v28  ;;  %1299 = vmatpush.bf16.msra.mxu2 %v2205_v36  ;;  %v2145_v28 = vor.u32 %v2890_v16, %v2142_v17  ;;  %v2574_v13 = vld [vmem:[#allocation5 + $0x4f0] sm:$0xf0] }
  0x36   :  { %v2701_v41 = vor.u32 %v3032_v32, %v2700_v30  ;;  %v2556_v43 = vld [vmem:[#allocation5 + $0x4c0] sm:$0xf]  ;;  %v2996_v44 = vld [vmem:[#allocation5 + $0x4cc] sm:$0xf0]  ;;  %1312 = vmatpush.bf16.msra.mxu3 %v2333_v39  ;;  %v2854_v30 = vld [vmem:[#allocation5 + $0x64] sm:$0xf]  ;;  %1274 = vmatmul.bf16.vlgmr.msra.gmra.mxu0 %v3261_v19 }
  0x37   :  { %v2684_v45 = vld [vmem:[#allocation5 + $0x5c0] sm:$0xf]  ;;  %v3028_v47 = vld [vmem:[#allocation5 + $0x5cc] sm:$0xf0]  ;;  %1318 = vmatpush.bf16.msrb.mxu0 %v2573_v40  ;;  %v2557_v52 = vor.u32 %v2996_v44, %v2556_v43  ;;  %v2886_v32 = vld [vmem:[#allocation5 + $0x164] sm:$0xf]  ;;  %1287 = vmatmul.bf16.vlgmr.msra.gmra.mxu1 %v3265_v22  ;;  %v2001_v36 = vor.u32 %v2854_v30, %v1998_v31 }
  0x38   :  { %v2540_v53 = vld [vmem:[#allocation5 + $0x4a0] sm:$0xf]  ;;  %1331 = vmatpush.bf16.msrb.mxu1 %v2701_v41  ;;  %v2685_v54 = vor.u32 %v3028_v47, %v2684_v45  ;;  %v2992_v56 = vld [vmem:[#allocation5 + $0x4ac] sm:$0xf0]  ;;  %v2129_v40 = vor.u32 %v2886_v32, %v2126_v33  ;;  %v1982_v43 = vld [vmem:[#allocation5 + $0x50] sm:$0xf0] }
  0x39   :  { %1344 = vmatpush.bf16.msrb.mxu2 %v2065_v42  ;;  %v2668_v57 = vld [vmem:[#allocation5 + $0x5a0] sm:$0xf]  ;;  %v3024_v58 = vld [vmem:[#allocation5 + $0x5ac] sm:$0xf0]  ;;  %v2541_v0 = vor.u32 %v2992_v56, %v2540_v53  ;;  %v2850_v42 = vld [vmem:[#allocation5 + $0x44] sm:$0xf] }
  0x3a   :  { %1357 = vmatpush.bf16.msrb.mxu3 %v2193_v46  ;;  %v2669_v1 = vor.u32 %v3024_v58, %v2668_v57  ;;  %v81_v2 = vld [vmem:[#allocation2 + $0x8] sm:$0xff]  ;;  %v2524_v5 = vld [vmem:[#allocation5 + $0x480] sm:$0xf]  ;;  %v2882_v44 = vld [vmem:[#allocation5 + $0x144] sm:$0xf]  ;;  %v1985_v48 = vor.u32 %v2850_v42, %v1982_v43 }
  0x3b   :  { %1319 = vmatpush.bf16.msrb.mxu0 %v2557_v52  ;;  %v2988_v6 = vld [vmem:[#allocation5 + $0x48c] sm:$0xf0]  ;;  %v2652_v7 = vld [vmem:[#allocation5 + $0x580] sm:$0xf]  ;;  %v290_v8 = vunpack.c.l.b16 %v81_v2  ;;  %v291_v10 = vunpack.c.h.b16 %v81_v2  ;;  %v2110_v45 = vld [vmem:[#allocation5 + $0x150] sm:$0xf0] }
  0x3c   :  { %1332 = vmatpush.bf16.msrb.mxu1 %v2685_v54  ;;  %v3020_v12 = vld [vmem:[#allocation5 + $0x58c] sm:$0xf0]  ;;  %v2525_v21 = vor.u32 %v2988_v6, %v2524_v5  ;;  %v2508_v25 = vld [vmem:[#allocation5 + $0x460] sm:$0xf]  ;;  %v2113_v52 = vor.u32 %v2882_v44, %v2110_v45  ;;  %v2846_v54 = vld [vmem:[#allocation5 + $0x24] sm:$0xf] }
  0x3d   :  { %1345 = vmatpush.bf16.msrb.mxu2 %v2049_v55  ;;  %v3259_v18 = vpack.c.b16 %v290_v8, %v290_v8  ;;  %v3263_v20 = vpack.c.b16 %v291_v10, %v291_v10  ;;  %v2653_v23 = vor.u32 %v3020_v12, %v2652_v7  ;;  %v2984_v26 = vld [vmem:[#allocation5 + $0x46c] sm:$0xf0]  ;;  %v2636_v27 = vld [vmem:[#allocation5 + $0x560] sm:$0xf]  ;;  %v1966_v55 = vld [vmem:[#allocation5 + $0x30] sm:$0xf0] }
  0x3e   :  { %1358 = vmatpush.bf16.msrb.mxu3 %v2177_v59  ;;  %v3016_v29 = vld [vmem:[#allocation5 + $0x56c] sm:$0xf0]  ;;  %v2509_v34 = vor.u32 %v2984_v26, %v2508_v25  ;;  %v2492_v37 = vld [vmem:[#allocation5 + $0x440] sm:$0xf]  ;;  %v2878_v56 = vld [vmem:[#allocation5 + $0x124] sm:$0xf]  ;;  %v1969_v63 = vor.u32 %v2846_v54, %v1966_v55 }
  0x3f   :  { %1320 = vmatpush.bf16.msrb.mxu0 %v2541_v0  ;;  %1300 = vmatmul.bf16.vlgmr.msra.gmra.mxu2 %v3259_v18  ;;  %v2637_v35 = vor.u32 %v3016_v29, %v2636_v27  ;;  %v2980_v38 = vld [vmem:[#allocation5 + $0x44c] sm:$0xf0]  ;;  %v2620_v39 = vld [vmem:[#allocation5 + $0x540] sm:$0xf]  ;;  %v2094_v57 = vld [vmem:[#allocation5 + $0x130] sm:$0xf0] }
  0x40   :  { %1333 = vmatpush.bf16.msrb.mxu1 %v2669_v1  ;;  %1313 = vmatmul.bf16.vlgmr.msra.gmra.mxu3 %v3263_v20  ;;  %v3012_v41 = vld [vmem:[#allocation5 + $0x54c] sm:$0xf0]  ;;  %v2493_v46 = vor.u32 %v2980_v38, %v2492_v37  ;;  %v2476_v49 = vld [vmem:[#allocation5 + $0x420] sm:$0xf]  ;;  %v2842_v1 = vld [vmem:[#allocation5 + $0x4] sm:$0xf]  ;;  %v2097_v3 = vor.u32 %v2878_v56, %v2094_v57 }
  0x41   :  { %1346 = vmatpush.bf16.msrb.mxu2 %v2033_v4  ;;  %v2621_v47 = vor.u32 %v3012_v41, %v2620_v39  ;;  %v2976_v50 = vld [vmem:[#allocation5 + $0x42c] sm:$0xf0]  ;;  %v2604_v51 = vld [vmem:[#allocation5 + $0x520] sm:$0xf]  ;;  %v82_v2 = vld [vmem:[#allocation2 + $0x10] sm:$0xff] }
  0x42   :  { %1359 = vmatpush.bf16.msrb.mxu3 %v2161_v11  ;;  %v3008_v53 = vld [vmem:[#allocation5 + $0x52c] sm:$0xf0]  ;;  %v2477_v58 = vor.u32 %v2976_v50, %v2476_v49  ;;  %v2460_v59 = vld [vmem:[#allocation5 + $0x400] sm:$0xf]  ;;  %v1950_v4 = vld [vmem:[#allocation5 + $0x10] sm:$0xf0]  ;;  %v292_v14 = vunpack.c.l.b16 %v82_v2 }
  0x43   :  { %1321 = vmatpush.bf16.msrb.mxu0 %v2525_v21  ;;  %v2972_v60 = vld [vmem:[#allocation5 + $0x40c] sm:$0xf0]  ;;  %v2588_v61 = vld [vmem:[#allocation5 + $0x500] sm:$0xf]  ;;  %v2605_v62 = vor.u32 %v3008_v53, %v2604_v51  ;;  %v2874_v5 = vld [vmem:[#allocation5 + $0x104] sm:$0xf]  ;;  %v1953_v16 = vor.u32 %v2842_v1, %v1950_v4 }
  0x44   :  { %1334 = vmatpush.bf16.msrb.mxu1 %v2653_v23  ;;  %v3004_v0 = vld [vmem:[#allocation5 + $0x50c] sm:$0xf0]  ;;  %v2078_v6 = vld [vmem:[#allocation5 + $0x110] sm:$0xf0]  ;;  %v2934_v7 = vld [vmem:[#allocation5 + $0x2e4] sm:$0xf]  ;;  %v2461_v10 = vor.u32 %v2972_v60, %v2460_v59  ;;  %v293_v23 = vunpack.c.h.b16 %v82_v2 }
  0x45   :  { %1347 = vmatpush.bf16.msrb.mxu2 %v2017_v24  ;;  %v2318_v8 = vld [vmem:[#allocation5 + $0x2f0] sm:$0xf0]  ;;  %v2998_v12 = vld [vmem:[#allocation5 + $0x4e4] sm:$0xf]  ;;  %v2589_v15 = vor.u32 %v3004_v0, %v2588_v61  ;;  %v2081_v24 = vor.u32 %v2874_v5, %v2078_v6 }
  0x46   :  { %1360 = vmatpush.bf16.msrb.mxu3 %v2145_v28  ;;  %v2446_v11 = vld [vmem:[#allocation5 + $0x3f0] sm:$0xf0]  ;;  %v3030_v17 = vld [vmem:[#allocation5 + $0x5e4] sm:$0xf]  ;;  %v2321_v25 = vor.u32 %v2934_v7, %v2318_v8  ;;  %v2577_v27 = vor.u32 %v2998_v12, %v2574_v13  ;;  %v3273_v38 = vpack.c.b16 %v293_v23, %v293_v23 }
  0x47   :  { %1322 = vmatpush.bf16.msrb.mxu0 %v2509_v34  ;;  %v2702_v21 = vld [vmem:[#allocation5 + $0x5f0] sm:$0xf0]  ;;  %v2449_v26 = vor.u32 %v2966_v9, %v2446_v11  ;;  %v2930_v28 = vld [vmem:[#allocation5 + $0x2c4] sm:$0xf] }
  0x48   :  { %1335 = vmatpush.bf16.msrb.mxu1 %v2637_v35  ;;  %v2302_v29 = vld [vmem:[#allocation5 + $0x2d0] sm:$0xf0]  ;;  %v2962_v30 = vld [vmem:[#allocation5 + $0x3c4] sm:$0xf]  ;;  %v2705_v31 = vor.u32 %v3030_v17, %v2702_v21  ;;  %v3271_v35 = vpack.c.b16 %v292_v14, %v292_v14 }
  0x49   :  { %1348 = vmatpush.bf16.msrb.mxu2 %v2001_v36  ;;  %v2430_v32 = vld [vmem:[#allocation5 + $0x3d0] sm:$0xf0]  ;;  %v2994_v33 = vld [vmem:[#allocation5 + $0x4c4] sm:$0xf]  ;;  %v2305_v39 = vor.u32 %v2930_v28, %v2302_v29 }
  0x4a   :  { %1361 = vmatpush.bf16.msrb.mxu3 %v2129_v40  ;;  %v2558_v34 = vld [vmem:[#allocation5 + $0x4d0] sm:$0xf0]  ;;  %v3026_v36 = vld [vmem:[#allocation5 + $0x5c4] sm:$0xf]  ;;  %v2433_v40 = vor.u32 %v2962_v30, %v2430_v32 }
  0x4b   :  { %1323 = vmatpush.bf16.msrb.mxu0 %v2493_v46  ;;  %v2686_v37 = vld [vmem:[#allocation5 + $0x5d0] sm:$0xf0]  ;;  %v2561_v41 = vor.u32 %v2994_v33, %v2558_v34  ;;  %v2926_v42 = vld [vmem:[#allocation5 + $0x2a4] sm:$0xf] }
  0x4c   :  { %1336 = vmatpush.bf16.msrb.mxu1 %v2621_v47  ;;  %v2286_v43 = vld [vmem:[#allocation5 + $0x2b0] sm:$0xf0]  ;;  %v2958_v44 = vld [vmem:[#allocation5 + $0x3a4] sm:$0xf]  ;;  %v2689_v45 = vor.u32 %v3026_v36, %v2686_v37 }
  0x4d   :  { %1349 = vmatpush.bf16.msrb.mxu2 %v1985_v48  ;;  %v2414_v46 = vld [vmem:[#allocation5 + $0x3b0] sm:$0xf0]  ;;  %v2990_v47 = vld [vmem:[#allocation5 + $0x4a4] sm:$0xf]  ;;  %v2289_v51 = vor.u32 %v2926_v42, %v2286_v43 }
  0x4e   :  { %1362 = vmatpush.bf16.msrb.mxu3 %v2113_v52  ;;  %v2542_v48 = vld [vmem:[#allocation5 + $0x4b0] sm:$0xf0]  ;;  %v3022_v49 = vld [vmem:[#allocation5 + $0x5a4] sm:$0xf]  ;;  %v2417_v52 = vor.u32 %v2958_v44, %v2414_v46 }
  0x4f   :  { %1324 = vmatpush.bf16.msrb.mxu0 %v2477_v58  ;;  %v2670_v50 = vld [vmem:[#allocation5 + $0x5b0] sm:$0xf0]  ;;  %v2545_v53 = vor.u32 %v2990_v47, %v2542_v48  ;;  %v2922_v54 = vld [vmem:[#allocation5 + $0x284] sm:$0xf] }
  0x50   :  { %1337 = vmatpush.bf16.msrb.mxu1 %v2605_v62  ;;  %v2270_v55 = vld [vmem:[#allocation5 + $0x290] sm:$0xf0]  ;;  %v2954_v56 = vld [vmem:[#allocation5 + $0x384] sm:$0xf]  ;;  %v2673_v57 = vor.u32 %v3022_v49, %v2670_v50 }
  0x51   :  { %1350 = vmatpush.bf16.msrb.mxu2 %v1969_v63  ;;  %v2398_v58 = vld [vmem:[#allocation5 + $0x390] sm:$0xf0]  ;;  %v2986_v59 = vld [vmem:[#allocation5 + $0x484] sm:$0xf]  ;;  %v2273_v63 = vor.u32 %v2922_v54, %v2270_v55  ;;  %v2873_v54 = vld [vmem:[#allocation5 + $0xf4] sm:$0xf0] }
  0x52   :  { %1363 = vmatpush.bf16.msrb.mxu3 %v2097_v3  ;;  %v2526_v60 = vld [vmem:[#allocation5 + $0x490] sm:$0xf0]  ;;  %v3018_v61 = vld [vmem:[#allocation5 + $0x584] sm:$0xf]  ;;  %v2401_v0 = vor.u32 %v2954_v56, %v2398_v58  ;;  %v2196_v55 = vld [vmem:[#allocation5 + $0x1e8] sm:$0xf] }
  0x53   :  { %1325 = vmatpush.bf16.msrb.mxu0 %v2461_v10  ;;  %v2654_v62 = vld [vmem:[#allocation5 + $0x590] sm:$0xf0]  ;;  %v2529_v1 = vor.u32 %v2986_v59, %v2526_v60  ;;  %v2918_v2 = vld [vmem:[#allocation5 + $0x264] sm:$0xf]  ;;  %v2324_v58 = vld [vmem:[#allocation5 + $0x2e8] sm:$0xf] }
  0x54   :  { %1338 = vmatpush.bf16.msrb.mxu1 %v2589_v15  ;;  %v2254_v3 = vld [vmem:[#allocation5 + $0x270] sm:$0xf0]  ;;  %v2950_v4 = vld [vmem:[#allocation5 + $0x364] sm:$0xf]  ;;  %v2657_v5 = vor.u32 %v3018_v61, %v2654_v62  ;;  %v2937_v59 = vld [vmem:[#allocation5 + $0x2f4] sm:$0xf0] }
  0x55   :  { %1351 = vmatpush.bf16.msrb.mxu2 %v1953_v16  ;;  %v2382_v6 = vld [vmem:[#allocation5 + $0x370] sm:$0xf0]  ;;  %v2982_v7 = vld [vmem:[#allocation5 + $0x464] sm:$0xf]  ;;  %v2257_v11 = vor.u32 %v2918_v2, %v2254_v3  ;;  %v2452_v62 = vld [vmem:[#allocation5 + $0x3e8] sm:$0xf]  ;;  %v2325_v3 = vor.u32 %v2937_v59, %v2324_v58 }
  0x56   :  { %1364 = vmatpush.bf16.msrb.mxu3 %v2081_v24  ;;  %1326 = vmatmul.bf16.vlgmr.msrb.gmra.mxu0 %v3271_v35  ;;  %v2510_v8 = vld [vmem:[#allocation5 + $0x470] sm:$0xf0]  ;;  %v3014_v9 = vld [vmem:[#allocation5 + $0x564] sm:$0xf]  ;;  %v2385_v12 = vor.u32 %v2950_v4, %v2382_v6  ;;  %v2052_v4 = vld [vmem:[#allocation5 + $0xc8] sm:$0xf] }
  0x57   :  { %1370 = vmatpush.bf16.msra.mxu0 %v2321_v25  ;;  %1339 = vmatmul.bf16.vlgmr.msrb.gmra.mxu1 %v3273_v38  ;;  %v2638_v10 = vld [vmem:[#allocation5 + $0x570] sm:$0xf0]  ;;  %v2513_v13 = vor.u32 %v2982_v7, %v2510_v8  ;;  %v2914_v14 = vld [vmem:[#allocation5 + $0x244] sm:$0xf]  ;;  %v2180_v6 = vld [vmem:[#allocation5 + $0x1c8] sm:$0xf] }
  0x58   :  { %1383 = vmatpush.bf16.msra.mxu1 %v2449_v26  ;;  %1352 = vmatmul.bf16.vlgmr.msrb.gmra.mxu2 %v3261_v19  ;;  %v2238_v15 = vld [vmem:[#allocation5 + $0x250] sm:$0xf0]  ;;  %v2946_v16 = vld [vmem:[#allocation5 + $0x344] sm:$0xf]  ;;  %v2641_v17 = vor.u32 %v3014_v9, %v2638_v10  ;;  %v2901_v8 = vld [vmem:[#allocation5 + $0x1d4] sm:$0xf0] }
  0x59   :  { %1396 = vmatpush.bf16.msra.mxu2 %v2577_v27  ;;  %1365 = vmatmul.bf16.vlgmr.msrb.gmra.mxu3 %v3265_v22  ;;  %v2366_v21 = vld [vmem:[#allocation5 + $0x350] sm:$0xf0]  ;;  %v2978_v23 = vld [vmem:[#allocation5 + $0x444] sm:$0xf]  ;;  %v2241_v27 = vor.u32 %v2914_v14, %v2238_v15  ;;  %v2308_v9 = vld [vmem:[#allocation5 + $0x2c8] sm:$0xf]  ;;  %v2181_v14 = vor.u32 %v2901_v8, %v2180_v6 }
  0x5a   :  { %1409 = vmatpush.bf16.msra.mxu3 %v2705_v31  ;;  %v2494_v24 = vld [vmem:[#allocation5 + $0x450] sm:$0xf0]  ;;  %v3010_v25 = vld [vmem:[#allocation5 + $0x544] sm:$0xf]  ;;  %v2369_v28 = vor.u32 %v2946_v16, %v2366_v21  ;;  %v2933_v10 = vld [vmem:[#allocation5 + $0x2d4] sm:$0xf0] }
  0x5b   :  { %1371 = vmatpush.bf16.msra.mxu0 %v2305_v39  ;;  %v2622_v26 = vld [vmem:[#allocation5 + $0x550] sm:$0xf0]  ;;  %v2497_v29 = vor.u32 %v2978_v23, %v2494_v24  ;;  %v2910_v30 = vld [vmem:[#allocation5 + $0x224] sm:$0xf]  ;;  %v2309_v15 = vor.u32 %v2933_v10, %v2308_v9  ;;  %v2036_v16 = vld [vmem:[#allocation5 + $0xa8] sm:$0xf] }
  0x5c   :  { %1384 = vmatpush.bf16.msra.mxu1 %v2433_v40  ;;  %v2222_v31 = vld [vmem:[#allocation5 + $0x230] sm:$0xf0]  ;;  %v2942_v32 = vld [vmem:[#allocation5 + $0x324] sm:$0xf]  ;;  %v2625_v33 = vor.u32 %v3010_v25, %v2622_v26  ;;  %v2164_v21 = vld [vmem:[#allocation5 + $0x1a8] sm:$0xf] }
  0x5d   :  { %1397 = vmatpush.bf16.msra.mxu2 %v2561_v41  ;;  %v2350_v34 = vld [vmem:[#allocation5 + $0x330] sm:$0xf0]  ;;  %v2974_v36 = vld [vmem:[#allocation5 + $0x424] sm:$0xf]  ;;  %v2225_v41 = vor.u32 %v2910_v30, %v2222_v31  ;;  %v2897_v24 = vld [vmem:[#allocation5 + $0x1b4] sm:$0xf0] }
  0x5e   :  { %1410 = vmatpush.bf16.msra.mxu3 %v2689_v45  ;;  %v2478_v37 = vld [vmem:[#allocation5 + $0x430] sm:$0xf0]  ;;  %v3006_v39 = vld [vmem:[#allocation5 + $0x524] sm:$0xf]  ;;  %v2353_v44 = vor.u32 %v2942_v32, %v2350_v34  ;;  %v2292_v25 = vld [vmem:[#allocation5 + $0x2a8] sm:$0xf]  ;;  %v2165_v30 = vor.u32 %v2897_v24, %v2164_v21 }
  0x5f   :  { %1372 = vmatpush.bf16.msra.mxu0 %v2289_v51  ;;  %v2606_v40 = vld [vmem:[#allocation5 + $0x530] sm:$0xf0]  ;;  %v2906_v42 = vld [vmem:[#allocation5 + $0x204] sm:$0xf]  ;;  %v2481_v45 = vor.u32 %v2974_v36, %v2478_v37  ;;  %v2929_v26 = vld [vmem:[#allocation5 + $0x2b4] sm:$0xf0] }
  0x60   :  { %1385 = vmatpush.bf16.msra.mxu1 %v2417_v52  ;;  %v2206_v43 = vld [vmem:[#allocation5 + $0x210] sm:$0xf0]  ;;  %v2938_v46 = vld [vmem:[#allocation5 + $0x304] sm:$0xf]  ;;  %v2609_v49 = vor.u32 %v3006_v39, %v2606_v40  ;;  %v2293_v31 = vor.u32 %v2929_v26, %v2292_v25  ;;  %v2020_v32 = vld [vmem:[#allocation5 + $0x88] sm:$0xf] }
  0x61   :  { %1398 = vmatpush.bf16.msra.mxu2 %v2545_v53  ;;  %v2334_v47 = vld [vmem:[#allocation5 + $0x310] sm:$0xf0]  ;;  %v2970_v48 = vld [vmem:[#allocation5 + $0x404] sm:$0xf]  ;;  %v2068_v53 = vld [vmem:[#allocation5 + $0xe8] sm:$0xf]  ;;  %v2209_v56 = vor.u32 %v2906_v42, %v2206_v43 }
  0x62   :  { %1411 = vmatpush.bf16.msra.mxu3 %v2673_v57  ;;  %v2462_v50 = vld [vmem:[#allocation5 + $0x410] sm:$0xf0]  ;;  %v3002_v51 = vld [vmem:[#allocation5 + $0x504] sm:$0xf]  ;;  %v2905_v57 = vld [vmem:[#allocation5 + $0x1f4] sm:$0xf0]  ;;  %v2337_v60 = vor.u32 %v2938_v46, %v2334_v47 }
  0x63   :  { %1373 = vmatpush.bf16.msra.mxu0 %v2273_v63  ;;  %v2590_v52 = vld [vmem:[#allocation5 + $0x510] sm:$0xf0]  ;;  %v2465_v61 = vor.u32 %v2970_v48, %v2462_v50  ;;  %v2969_v63 = vld [vmem:[#allocation5 + $0x3f4] sm:$0xf0]  ;;  %v2197_v2 = vor.u32 %v2905_v57, %v2196_v55  ;;  %v2148_v34 = vld [vmem:[#allocation5 + $0x188] sm:$0xf] }
  0x64   :  { %1386 = vmatpush.bf16.msra.mxu1 %v2401_v0  ;;  %v2593_v0 = vor.u32 %v3002_v51, %v2590_v52  ;;  %v2453_v7 = vor.u32 %v2969_v63, %v2452_v62  ;;  %v2893_v37 = vld [vmem:[#allocation5 + $0x194] sm:$0xf0]  ;;  %v2276_v39 = vld [vmem:[#allocation5 + $0x288] sm:$0xf] }
  0x65   :  { %1399 = vmatpush.bf16.msra.mxu2 %v2529_v1  ;;  %v2069_v1 = vor.u32 %v2873_v54, %v2068_v53  ;;  %v2925_v40 = vld [vmem:[#allocation5 + $0x294] sm:$0xf0]  ;;  %v2004_v46 = vld [vmem:[#allocation5 + $0x68] sm:$0xf] }
  0x66   :  { %1412 = vmatpush.bf16.msra.mxu3 %v2657_v5  ;;  %v2869_v5 = vld [vmem:[#allocation5 + $0xd4] sm:$0xf0]  ;;  %v2132_v48 = vld [vmem:[#allocation5 + $0x168] sm:$0xf] }
  0x67   :  { %1374 = vmatpush.bf16.msra.mxu0 %v2257_v11  ;;  %v2436_v11 = vld [vmem:[#allocation5 + $0x3c8] sm:$0xf]  ;;  %v2957_v42 = vld [vmem:[#allocation5 + $0x394] sm:$0xf0] }
  0x68   :  { %1387 = vmatpush.bf16.msra.mxu1 %v2385_v12  ;;  %v2965_v12 = vld [vmem:[#allocation5 + $0x3d4] sm:$0xf0]  ;;  %v2260_v51 = vld [vmem:[#allocation5 + $0x268] sm:$0xf] }
  0x69   :  { %1400 = vmatpush.bf16.msra.mxu2 %v2513_v13  ;;  %v2053_v13 = vor.u32 %v2869_v5, %v2052_v4  ;;  %v2437_v23 = vor.u32 %v2965_v12, %v2436_v11  ;;  %v2857_v47 = vld [vmem:[#allocation5 + $0x74] sm:$0xf0]  ;;  %v2388_v53 = vld [vmem:[#allocation5 + $0x368] sm:$0xf] }
  0x6a   :  { %1413 = vmatpush.bf16.msra.mxu3 %v2641_v17  ;;  %v2865_v17 = vld [vmem:[#allocation5 + $0xb4] sm:$0xf0]  ;;  %v2005_v55 = vor.u32 %v2857_v47, %v2004_v46  ;;  %v1988_v58 = vld [vmem:[#allocation5 + $0x48] sm:$0xf] }
  0x6b   :  { %1375 = vmatpush.bf16.msra.mxu0 %v2241_v27  ;;  %v2420_v27 = vld [vmem:[#allocation5 + $0x3a8] sm:$0xf]  ;;  %v2889_v50 = vld [vmem:[#allocation5 + $0x174] sm:$0xf0] }
  0x6c   :  { %1388 = vmatpush.bf16.msra.mxu1 %v2369_v28  ;;  %v2961_v28 = vld [vmem:[#allocation5 + $0x3b4] sm:$0xf0]  ;;  %v2244_v63 = vld [vmem:[#allocation5 + $0x248] sm:$0xf] }
  0x6d   :  { %1401 = vmatpush.bf16.msra.mxu2 %v2497_v29  ;;  %v2037_v29 = vor.u32 %v2865_v17, %v2036_v16  ;;  %v2421_v36 = vor.u32 %v2961_v28, %v2420_v27  ;;  %v2921_v52 = vld [vmem:[#allocation5 + $0x274] sm:$0xf0]  ;;  %v1972_v6 = vld [vmem:[#allocation5 + $0x28] sm:$0xf] }
  0x6e   :  { %1414 = vmatpush.bf16.msra.mxu3 %v2625_v33  ;;  %v2861_v33 = vld [vmem:[#allocation5 + $0x94] sm:$0xf0]  ;;  %v2261_v57 = vor.u32 %v2921_v52, %v2260_v51  ;;  %v2100_v8 = vld [vmem:[#allocation5 + $0x128] sm:$0xf] }
  0x6f   :  { %1376 = vmatpush.bf16.msra.mxu0 %v2225_v41  ;;  %v2404_v41 = vld [vmem:[#allocation5 + $0x388] sm:$0xf]  ;;  %v2021_v43 = vor.u32 %v2861_v33, %v2020_v32  ;;  %v2953_v54 = vld [vmem:[#allocation5 + $0x374] sm:$0xf0] }
  0x70   :  { %1389 = vmatpush.bf16.msra.mxu1 %v2353_v44  ;;  %v2149_v44 = vor.u32 %v2893_v37, %v2148_v34  ;;  %v2853_v59 = vld [vmem:[#allocation5 + $0x54] sm:$0xf0]  ;;  %v2228_v11 = vld [vmem:[#allocation5 + $0x228] sm:$0xf]  ;;  %v2871_v37 = vld [vmem:[#allocation5 + $0xec] sm:$0xf] }
  0x71   :  { %1402 = vmatpush.bf16.msra.mxu2 %v2481_v45  ;;  %v2277_v45 = vor.u32 %v2925_v40, %v2276_v39  ;;  %v2885_v62 = vld [vmem:[#allocation5 + $0x154] sm:$0xf0]  ;;  %v1956_v16 = vld [vmem:[#allocation5 + $0x8] sm:$0xf]  ;;  %v2070_v39 = vld [vmem:[#allocation5 + $0xf8] sm:$0xf0] }
  0x72   :  { %1415 = vmatpush.bf16.msra.mxu3 %v2609_v49  ;;  %v2405_v49 = vor.u32 %v2957_v42, %v2404_v41  ;;  %v2881_v10 = vld [vmem:[#allocation5 + $0x134] sm:$0xf0]  ;;  %v2084_v24 = vld [vmem:[#allocation5 + $0x108] sm:$0xf]  ;;  %v2903_v42 = vld [vmem:[#allocation5 + $0x1ec] sm:$0xf]  ;;  %v2073_v47 = vor.u32 %v2871_v37, %v2070_v39 }
  0x73   :  { %1377 = vmatpush.bf16.msra.mxu0 %v2209_v56  ;;  %v2133_v56 = vor.u32 %v2889_v50, %v2132_v48  ;;  %v2913_v12 = vld [vmem:[#allocation5 + $0x234] sm:$0xf0]  ;;  %v2101_v21 = vor.u32 %v2881_v10, %v2100_v8  ;;  %v2212_v26 = vld [vmem:[#allocation5 + $0x208] sm:$0xf] }
  0x74   :  { %1390 = vmatpush.bf16.msra.mxu1 %v2337_v60  ;;  %v2116_v60 = vld [vmem:[#allocation5 + $0x148] sm:$0xf]  ;;  %v2845_v17 = vld [vmem:[#allocation5 + $0x14] sm:$0xf0] }
  0x75   :  { %1403 = vmatpush.bf16.msra.mxu2 %v2465_v61  ;;  %v2389_v61 = vor.u32 %v2953_v54, %v2388_v53  ;;  %v2117_v4 = vor.u32 %v2885_v62, %v2116_v60  ;;  %v2877_v25 = vld [vmem:[#allocation5 + $0x114] sm:$0xf0]  ;;  %v2708_v33 = vld [vmem:[#allocation5 + $0x5e8] sm:$0xf]  ;;  %v1957_v34 = vor.u32 %v2845_v17, %v1956_v16  ;;  %v2867_v53 = vld [vmem:[#allocation5 + $0xcc] sm:$0xf] }
  0x76   :  { %1416 = vmatpush.bf16.msra.mxu3 %v2593_v0  ;;  %1378 = vmatmul.bf16.vlgmr.msra.gmra.mxu0 %v3259_v18  ;;  %v2917_v0 = vld [vmem:[#allocation5 + $0x254] sm:$0xf0]  ;;  %v2085_v40 = vor.u32 %v2877_v25, %v2084_v24  ;;  %v2564_v48 = vld [vmem:[#allocation5 + $0x4c8] sm:$0xf]  ;;  %v2054_v54 = vld [vmem:[#allocation5 + $0xd8] sm:$0xf0] }
  0x77   :  { %1422 = vmatpush.bf16.msrb.mxu0 %v2069_v1  ;;  %1391 = vmatmul.bf16.vlgmr.msra.gmra.mxu1 %v3263_v20  ;;  %v2372_v1 = vld [vmem:[#allocation5 + $0x348] sm:$0xf]  ;;  %v2245_v5 = vor.u32 %v2917_v0, %v2244_v63  ;;  %v2909_v28 = vld [vmem:[#allocation5 + $0x214] sm:$0xf0]  ;;  %v2150_v16 = vld [vmem:[#allocation5 + $0x198] sm:$0xf0] }
  0x78   :  { %1435 = vmatpush.bf16.msrb.mxu1 %v2197_v2  ;;  %1404 = vmatmul.bf16.vlgmr.msra.gmra.mxu2 %v3271_v35  ;;  %v2949_v2 = vld [vmem:[#allocation5 + $0x354] sm:$0xf0]  ;;  %v2213_v41 = vor.u32 %v2909_v28, %v2212_v26  ;;  %v2692_v50 = vld [vmem:[#allocation5 + $0x5c8] sm:$0xf] }
  0x79   :  { %1448 = vmatpush.bf16.msrb.mxu2 %v2325_v3  ;;  %1417 = vmatmul.bf16.vlgmr.msra.gmra.mxu3 %v3273_v38  ;;  %v1989_v3 = vor.u32 %v2853_v59, %v1988_v58  ;;  %v2373_v9 = vor.u32 %v2949_v2, %v2372_v1  ;;  %v3001_v32 = vld [vmem:[#allocation5 + $0x4f4] sm:$0xf0]  ;;  %v2057_v59 = vor.u32 %v2867_v53, %v2054_v54  ;;  %v2548_v60 = vld [vmem:[#allocation5 + $0x4a8] sm:$0xf]  ;;  %v2863_v1 = vld [vmem:[#allocation5 + $0xac] sm:$0xf] }
  0x7a   :  { %1461 = vmatpush.bf16.msrb.mxu3 %v2453_v7  ;;  %v2849_v7 = vld [vmem:[#allocation5 + $0x34] sm:$0xf0]  ;;  %v2676_v62 = vld [vmem:[#allocation5 + $0x5a8] sm:$0xf]  ;;  %v2038_v2 = vld [vmem:[#allocation5 + $0xb8] sm:$0xf0] }
  0x7b   :  { %1423 = vmatpush.bf16.msrb.mxu0 %v2053_v13  ;;  %v2356_v13 = vld [vmem:[#allocation5 + $0x328] sm:$0xf]  ;;  %v3029_v52 = vld [vmem:[#allocation5 + $0x5d4] sm:$0xf0] }
  0x7c   :  { %1436 = vmatpush.bf16.msrb.mxu1 %v2181_v14  ;;  %v2945_v14 = vld [vmem:[#allocation5 + $0x334] sm:$0xf0]  ;;  %v2693_v58 = vor.u32 %v3029_v52, %v2692_v50  ;;  %v2532_v8 = vld [vmem:[#allocation5 + $0x488] sm:$0xf] }
  0x7d   :  { %1449 = vmatpush.bf16.msrb.mxu2 %v2309_v15  ;;  %v1973_v15 = vor.u32 %v2849_v7, %v1972_v6  ;;  %v2357_v27 = vor.u32 %v2945_v14, %v2356_v13  ;;  %v3025_v0 = vld [vmem:[#allocation5 + $0x5b4] sm:$0xf0]  ;;  %v2041_v7 = vor.u32 %v2863_v1, %v2038_v2  ;;  %v2660_v10 = vld [vmem:[#allocation5 + $0x588] sm:$0xf]  ;;  %v2859_v13 = vld [vmem:[#allocation5 + $0x8c] sm:$0xf] }
  0x7e   :  { %1462 = vmatpush.bf16.msrb.mxu3 %v2437_v23  ;;  %v2229_v23 = vor.u32 %v2913_v12, %v2228_v11  ;;  %v2677_v6 = vor.u32 %v3025_v0, %v2676_v62  ;;  %v3021_v12 = vld [vmem:[#allocation5 + $0x594] sm:$0xf0]  ;;  %v2022_v14 = vld [vmem:[#allocation5 + $0x98] sm:$0xf0]  ;;  %v2516_v24 = vld [vmem:[#allocation5 + $0x468] sm:$0xf] }
  0x7f   :  { %1424 = vmatpush.bf16.msrb.mxu0 %v2037_v29  ;;  %v2340_v29 = vld [vmem:[#allocation5 + $0x308] sm:$0xf]  ;;  %v2985_v25 = vld [vmem:[#allocation5 + $0x474] sm:$0xf0]  ;;  %v2843_v2 = vld [vmem:[#allocation5 + $0xc] sm:$0xf] }
  0x80   :  { %1437 = vmatpush.bf16.msrb.mxu1 %v2165_v30  ;;  %v2941_v30 = vld [vmem:[#allocation5 + $0x314] sm:$0xf0]  ;;  %v2644_v26 = vld [vmem:[#allocation5 + $0x568] sm:$0xf] }
  0x81   :  { %1450 = vmatpush.bf16.msrb.mxu2 %v2293_v31  ;;  %v2580_v31 = vld [vmem:[#allocation5 + $0x4e8] sm:$0xf]  ;;  %v3017_v28 = vld [vmem:[#allocation5 + $0x574] sm:$0xf0] }
  0x82   :  { %1463 = vmatpush.bf16.msrb.mxu3 %v2421_v36  ;;  %v3033_v36 = vld [vmem:[#allocation5 + $0x5f4] sm:$0xf0]  ;;  %v2500_v37 = vld [vmem:[#allocation5 + $0x448] sm:$0xf] }
  0x83   :  { %1425 = vmatpush.bf16.msrb.mxu0 %v2021_v43  ;;  %v2198_v43 = vld [vmem:[#allocation5 + $0x1f8] sm:$0xf0]  ;;  %v2709_v46 = vor.u32 %v3033_v36, %v2708_v33  ;;  %v2517_v33 = vor.u32 %v2985_v25, %v2516_v24  ;;  %v2981_v39 = vld [vmem:[#allocation5 + $0x454] sm:$0xf0]  ;;  %v2484_v50 = vld [vmem:[#allocation5 + $0x428] sm:$0xf] }
  0x84   :  { %1438 = vmatpush.bf16.msrb.mxu1 %v2149_v44  ;;  %v2341_v44 = vor.u32 %v2941_v30, %v2340_v29  ;;  %v2201_v51 = vor.u32 %v2903_v42, %v2198_v43  ;;  %v2855_v29 = vld [vmem:[#allocation5 + $0x6c] sm:$0xf]  ;;  %v2006_v30 = vld [vmem:[#allocation5 + $0x78] sm:$0xf0]  ;;  %v3013_v42 = vld [vmem:[#allocation5 + $0x554] sm:$0xf0] }
  0x85   :  { %1451 = vmatpush.bf16.msrb.mxu2 %v2277_v45  ;;  %v2581_v45 = vor.u32 %v3001_v32, %v2580_v31  ;;  %v2887_v31 = vld [vmem:[#allocation5 + $0x16c] sm:$0xf]  ;;  %v2134_v32 = vld [vmem:[#allocation5 + $0x178] sm:$0xf0]  ;;  %v2009_v36 = vor.u32 %v2855_v29, %v2006_v30  ;;  %v2612_v52 = vld [vmem:[#allocation5 + $0x528] sm:$0xf] }
  0x86   :  { %1464 = vmatpush.bf16.msrb.mxu3 %v2405_v49  ;;  %v2997_v49 = vld [vmem:[#allocation5 + $0x4d4] sm:$0xf0]  ;;  %v2851_v43 = vld [vmem:[#allocation5 + $0x4c] sm:$0xf]  ;;  %v2596_v0 = vld [vmem:[#allocation5 + $0x508] sm:$0xf] }
  0x87   :  { %1426 = vmatpush.bf16.msrb.mxu0 %v2005_v55  ;;  %v2899_v55 = vld [vmem:[#allocation5 + $0x1cc] sm:$0xf]  ;;  %v3009_v54 = vld [vmem:[#allocation5 + $0x534] sm:$0xf0]  ;;  %v2438_v30 = vld [vmem:[#allocation5 + $0x3d8] sm:$0xf0] }
  0x88   :  { %1439 = vmatpush.bf16.msrb.mxu1 %v2133_v56  ;;  %v2182_v56 = vld [vmem:[#allocation5 + $0x1d8] sm:$0xf0]  ;;  %v2613_v62 = vor.u32 %v3009_v54, %v2612_v52  ;;  %v3005_v1 = vld [vmem:[#allocation5 + $0x514] sm:$0xf0]  ;;  %v2923_v52 = vld [vmem:[#allocation5 + $0x28c] sm:$0xf] }
  0x89   :  { %1452 = vmatpush.bf16.msrb.mxu2 %v2261_v57  ;;  %v2565_v57 = vor.u32 %v2997_v49, %v2564_v48  ;;  %v2185_v63 = vor.u32 %v2899_v55, %v2182_v56  ;;  %v2847_v55 = vld [vmem:[#allocation5 + $0x2c] sm:$0xf]  ;;  %v1974_v56 = vld [vmem:[#allocation5 + $0x38] sm:$0xf0] }
  0x8a   :  { %1465 = vmatpush.bf16.msrb.mxu3 %v2389_v61  ;;  %v2993_v61 = vld [vmem:[#allocation5 + $0x4b4] sm:$0xf0]  ;;  %v2955_v54 = vld [vmem:[#allocation5 + $0x38c] sm:$0xf] }
  0x8b   :  { %1427 = vmatpush.bf16.msrb.mxu0 %v1989_v3  ;;  %v2895_v3 = vld [vmem:[#allocation5 + $0x1ac] sm:$0xf] }
  0x8c   :  { %1440 = vmatpush.bf16.msrb.mxu1 %v2117_v4  ;;  %v2166_v4 = vld [vmem:[#allocation5 + $0x1b8] sm:$0xf0] }
  0x8d   :  { %1453 = vmatpush.bf16.msrb.mxu2 %v2245_v5  ;;  %v2549_v5 = vor.u32 %v2993_v61, %v2548_v60  ;;  %v2169_v11 = vor.u32 %v2895_v3, %v2166_v4  ;;  %v2468_v60 = vld [vmem:[#allocation5 + $0x408] sm:$0xf]  ;;  %v2973_v61 = vld [vmem:[#allocation5 + $0x414] sm:$0xf0]  ;;  %v1958_v4 = vld [vmem:[#allocation5 + $0x18] sm:$0xf0] }
  0x8e   :  { %1466 = vmatpush.bf16.msrb.mxu3 %v2373_v9  ;;  %v2989_v9 = vld [vmem:[#allocation5 + $0x494] sm:$0xf0] }
  0x8f   :  { %1428 = vmatpush.bf16.msrb.mxu0 %v1973_v15  ;;  %v2891_v15 = vld [vmem:[#allocation5 + $0x18c] sm:$0xf]  ;;  %v2533_v17 = vor.u32 %v2989_v9, %v2532_v8  ;;  %v2326_v8 = vld [vmem:[#allocation5 + $0x2f8] sm:$0xf0] }
  0x90   :  { %1441 = vmatpush.bf16.msrb.mxu1 %v2101_v21  ;;  %v2661_v21 = vor.u32 %v3021_v12, %v2660_v10  ;;  %v2967_v9 = vld [vmem:[#allocation5 + $0x3ec] sm:$0xf]  ;;  %v2469_v10 = vor.u32 %v2973_v61, %v2468_v60 }
  0x91   :  { %1454 = vmatpush.bf16.msrb.mxu2 %v2229_v23  ;;  %v2025_v23 = vor.u32 %v2859_v13, %v2022_v14  ;;  %v2999_v12 = vld [vmem:[#allocation5 + $0x4ec] sm:$0xf]  ;;  %v2582_v13 = vld [vmem:[#allocation5 + $0x4f8] sm:$0xf0]  ;;  %v2597_v14 = vor.u32 %v3005_v1, %v2596_v0 }
  0x92   :  { %1467 = vmatpush.bf16.msrb.mxu3 %v2357_v27  ;;  %v2153_v27 = vor.u32 %v2891_v15, %v2150_v16  ;;  %v1961_v15 = vor.u32 %v2843_v2, %v1958_v4  ;;  %v3031_v16 = vld [vmem:[#allocation5 + $0x5ec] sm:$0xf]  ;;  %v2585_v25 = vor.u32 %v2999_v12, %v2582_v13  ;;  %v2390_v2 = vld [vmem:[#allocation5 + $0x378] sm:$0xf0] }
  0x93   :  { %1429 = vmatpush.bf16.msrb.mxu0 %v1957_v34  ;;  %v2645_v34 = vor.u32 %v3017_v28, %v2644_v26  ;;  %v2931_v26 = vld [vmem:[#allocation5 + $0x2cc] sm:$0xf]  ;;  %v2518_v4 = vld [vmem:[#allocation5 + $0x478] sm:$0xf0] }
  0x94   :  { %1442 = vmatpush.bf16.msrb.mxu1 %v2085_v40  ;;  %v2628_v40 = vld [vmem:[#allocation5 + $0x548] sm:$0xf]  ;;  %v2963_v28 = vld [vmem:[#allocation5 + $0x3cc] sm:$0xf] }
  0x95   :  { %1455 = vmatpush.bf16.msrb.mxu2 %v2213_v41  ;;  %v2137_v41 = vor.u32 %v2887_v31, %v2134_v32  ;;  %v2629_v48 = vor.u32 %v3013_v42, %v2628_v40  ;;  %v2995_v31 = vld [vmem:[#allocation5 + $0x4cc] sm:$0xf]  ;;  %v2566_v32 = vld [vmem:[#allocation5 + $0x4d8] sm:$0xf0] }
  0x96   :  { %1468 = vmatpush.bf16.msrb.mxu3 %v2341_v44  ;;  %1430 = vmatmul.bf16.vlgmr.msrb.gmra.mxu0 %v3261_v19  ;;  %v1990_v44 = vld [vmem:[#allocation5 + $0x58] sm:$0xf0]  ;;  %v2927_v40 = vld [vmem:[#allocation5 + $0x2ac] sm:$0xf] }
  0x97   :  { %1474 = vmatpush.bf16.msra.mxu0 %v2581_v45  ;;  %1443 = vmatmul.bf16.vlgmr.msrb.gmra.mxu1 %v3265_v22  ;;  %v2883_v45 = vld [vmem:[#allocation5 + $0x14c] sm:$0xf]  ;;  %v1993_v49 = vor.u32 %v2851_v43, %v1990_v44  ;;  %v2422_v44 = vld [vmem:[#allocation5 + $0x3b8] sm:$0xf0] }
  0x98   :  { %1487 = vmatpush.bf16.msra.mxu1 %v2709_v46  ;;  %1456 = vmatmul.bf16.vlgmr.msrb.gmra.mxu2 %v3259_v18  ;;  %v2118_v46 = vld [vmem:[#allocation5 + $0x158] sm:$0xf0]  ;;  %v2959_v42 = vld [vmem:[#allocation5 + $0x3ac] sm:$0xf] }
  0x99   :  { %1500 = vmatpush.bf16.msra.mxu2 %v2073_v47  ;;  %1469 = vmatmul.bf16.vlgmr.msrb.gmra.mxu3 %v3263_v20  ;;  %v2501_v47 = vor.u32 %v2981_v39, %v2500_v37  ;;  %v2121_v53 = vor.u32 %v2883_v45, %v2118_v46  ;;  %v2441_v37 = vor.u32 %v2963_v28, %v2438_v30  ;;  %v2991_v45 = vld [vmem:[#allocation5 + $0x4ac] sm:$0xf]  ;;  %v2550_v46 = vld [vmem:[#allocation5 + $0x4b8] sm:$0xf0] }
  0x9a   :  { %1513 = vmatpush.bf16.msra.mxu3 %v2201_v51  ;;  %v2977_v51 = vld [vmem:[#allocation5 + $0x434] sm:$0xf0]  ;;  %v2569_v39 = vor.u32 %v2995_v31, %v2566_v32  ;;  %v2951_v0 = vld [vmem:[#allocation5 + $0x36c] sm:$0xf]  ;;  %v2230_v28 = vld [vmem:[#allocation5 + $0x238] sm:$0xf0] }
  0x9b   :  { %1475 = vmatpush.bf16.msra.mxu0 %v2565_v57  ;;  %v2879_v57 = vld [vmem:[#allocation5 + $0x12c] sm:$0xf]  ;;  %v2358_v32 = vld [vmem:[#allocation5 + $0x338] sm:$0xf0] }
  0x9c   :  { %1488 = vmatpush.bf16.msra.mxu1 %v2693_v58  ;;  %v2102_v58 = vld [vmem:[#allocation5 + $0x138] sm:$0xf0]  ;;  %v2947_v12 = vld [vmem:[#allocation5 + $0x34c] sm:$0xf] }
  0x9d   :  { %1501 = vmatpush.bf16.msra.mxu2 %v2057_v59  ;;  %v2485_v59 = vor.u32 %v2977_v51, %v2484_v50  ;;  %v2105_v3 = vor.u32 %v2879_v57, %v2102_v58  ;;  %v2425_v50 = vor.u32 %v2959_v42, %v2422_v44  ;;  %v2553_v51 = vor.u32 %v2991_v45, %v2550_v46  ;;  %v2987_v57 = vld [vmem:[#allocation5 + $0x48c] sm:$0xf]  ;;  %v2534_v58 = vld [vmem:[#allocation5 + $0x498] sm:$0xf0] }
  0x9e   :  { %1514 = vmatpush.bf16.msra.mxu3 %v2185_v63  ;;  %v1977_v63 = vor.u32 %v2847_v55, %v1974_v56  ;;  %v2406_v56 = vld [vmem:[#allocation5 + $0x398] sm:$0xf0]  ;;  %v2907_v42 = vld [vmem:[#allocation5 + $0x20c] sm:$0xf] }
  0x9f   :  { %1476 = vmatpush.bf16.msra.mxu0 %v2549_v5  ;;  %v2875_v5 = vld [vmem:[#allocation5 + $0x10c] sm:$0xf]  ;;  %v2409_v61 = vor.u32 %v2955_v54, %v2406_v56  ;;  %v3291_v54 = vld [vmem:[#allocation7] sm:$0xf] }
  0xa0   :  { %1489 = vmatpush.bf16.msra.mxu1 %v2677_v6  ;;  %v2086_v6 = vld [vmem:[#allocation5 + $0x118] sm:$0xf0]  ;;  %v2939_v44 = vld [vmem:[#allocation5 + $0x30c] sm:$0xf] }
  0xa1   :  { %1502 = vmatpush.bf16.msra.mxu2 %v2041_v7  ;;  %v2935_v7 = vld [vmem:[#allocation5 + $0x2ec] sm:$0xf] }
  0xa2   :  { %1515 = vmatpush.bf16.msra.mxu3 %v2169_v11  ;;  %v2454_v11 = vld [vmem:[#allocation5 + $0x3f8] sm:$0xf0] }
  0xa3   :  { %1477 = vmatpush.bf16.msra.mxu0 %v2533_v17  ;;  %v2710_v17 = vld [vmem:[#allocation5 + $0x5f8] sm:$0xf0]  ;;  %v2457_v24 = vor.u32 %v2967_v9, %v2454_v11 }
  0xa4   :  { %1490 = vmatpush.bf16.msra.mxu1 %v2661_v21  ;;  %v2089_v21 = vor.u32 %v2875_v5, %v2086_v6  ;;  %v2713_v29 = vor.u32 %v3031_v16, %v2710_v17  ;;  %v3015_v5 = vld [vmem:[#allocation5 + $0x56c] sm:$0xf]  ;;  %v2646_v6 = vld [vmem:[#allocation5 + $0x578] sm:$0xf0] }
  0xa5   :  { %1503 = vmatpush.bf16.msra.mxu2 %v2025_v23  ;;  %v2329_v23 = vor.u32 %v2935_v7, %v2326_v8  ;;  %v2393_v8 = vor.u32 %v2951_v0, %v2390_v2  ;;  %v2246_v11 = vld [vmem:[#allocation5 + $0x258] sm:$0xf0]  ;;  %v2649_v13 = vor.u32 %v3015_v5, %v2646_v6  ;;  %v3011_v17 = vld [vmem:[#allocation5 + $0x54c] sm:$0xf]  ;;  %v3038_v6 = vld [vmem:[#allocation8 + $0x20] sm:$0xff] }
  0xa6   :  { %1516 = vmatpush.bf16.msra.mxu3 %v2153_v27  ;;  %v2310_v27 = vld [vmem:[#allocation5 + $0x2d8] sm:$0xf0]  ;;  %v3039_v2 = vld [vmem:[#allocation8 + $0x28] sm:$0xff] }
  0xa7   :  { %1478 = vmatpush.bf16.msra.mxu0 %v2517_v33  ;;  %v3027_v33 = vld [vmem:[#allocation5 + $0x5cc] sm:$0xf]  ;;  %v2502_v16 = vld [vmem:[#allocation5 + $0x458] sm:$0xf0] }
  0xa8   :  { %1491 = vmatpush.bf16.msra.mxu1 %v2645_v34  ;;  %v2694_v34 = vld [vmem:[#allocation5 + $0x5d8] sm:$0xf0] }
  0xa9   :  { %1504 = vmatpush.bf16.msra.mxu2 %v2009_v36  ;;  %v2313_v36 = vor.u32 %v2931_v26, %v2310_v27  ;;  %v2697_v43 = vor.u32 %v3027_v33, %v2694_v34  ;;  %v2911_v27 = vld [vmem:[#allocation5 + $0x22c] sm:$0xf]  ;;  %v2486_v34 = vld [vmem:[#allocation5 + $0x438] sm:$0xf0] }
  0xaa   :  { %1517 = vmatpush.bf16.msra.mxu3 %v2137_v41  ;;  %v2294_v41 = vld [vmem:[#allocation5 + $0x2b8] sm:$0xf0]  ;;  %v2975_v33 = vld [vmem:[#allocation5 + $0x42c] sm:$0xf] }
  0xab   :  { %1479 = vmatpush.bf16.msra.mxu0 %v2501_v47  ;;  %v3023_v47 = vld [vmem:[#allocation5 + $0x5ac] sm:$0xf] }
  0xac   :  { %1492 = vmatpush.bf16.msra.mxu1 %v2629_v48  ;;  %v2678_v48 = vld [vmem:[#allocation5 + $0x5b8] sm:$0xf0] }
  0xad   :  { %1505 = vmatpush.bf16.msra.mxu2 %v1993_v49  ;;  %v2297_v49 = vor.u32 %v2927_v40, %v2294_v41  ;;  %v2681_v55 = vor.u32 %v3023_v47, %v2678_v48  ;;  %v2489_v41 = vor.u32 %v2975_v33, %v2486_v34  ;;  %v2342_v47 = vld [vmem:[#allocation5 + $0x318] sm:$0xf0]  ;;  %v2971_v48 = vld [vmem:[#allocation5 + $0x40c] sm:$0xf] }
  0xae   :  { %1518 = vmatpush.bf16.msra.mxu3 %v2121_v53  ;;  %v2278_v53 = vld [vmem:[#allocation5 + $0x298] sm:$0xf0]  ;;  %v2345_v56 = vor.u32 %v2939_v44, %v2342_v47 }
  0xaf   :  { %1480 = vmatpush.bf16.msra.mxu0 %v2485_v59  ;;  %v3019_v59 = vld [vmem:[#allocation5 + $0x58c] sm:$0xf]  ;;  %v2281_v60 = vor.u32 %v2923_v52, %v2278_v53  ;;  %v2598_v52 = vld [vmem:[#allocation5 + $0x518] sm:$0xf0] }
  0xb0   :  { %1493 = vmatpush.bf16.msra.mxu1 %v2613_v62  ;;  %v2919_v62 = vld [vmem:[#allocation5 + $0x26c] sm:$0xf] }
  0xb1   :  { %1506 = vmatpush.bf16.msra.mxu2 %v1977_v63  ;;  %v2262_v63 = vld [vmem:[#allocation5 + $0x278] sm:$0xf0] }
  0xb2   :  { %1519 = vmatpush.bf16.msra.mxu3 %v2105_v3  ;;  %v2983_v3 = vld [vmem:[#allocation5 + $0x46c] sm:$0xf]  ;;  %v2265_v7 = vor.u32 %v2919_v62, %v2262_v63  ;;  %v3040_v62 = vld [vmem:[#allocation8 + $0x30] sm:$0xff] }
  0xb3   :  { %1481 = vmatpush.bf16.msra.mxu0 %v2469_v10  ;;  %v2521_v9 = vor.u32 %v2983_v3, %v2518_v4  ;;  %v2915_v10 = vld [vmem:[#allocation5 + $0x24c] sm:$0xf] }
  0xb4   :  { %1494 = vmatpush.bf16.msra.mxu1 %v2597_v14  ;;  %v2374_v14 = vld [vmem:[#allocation5 + $0x358] sm:$0xf0]  ;;  %v1288_v30 = vpop.f32.mrf.mxu1  ;;  %v3047_v4 = vld [vmem:[#allocation8 + $0x68] sm:$0xff] }
  0xb5   :  { %1507 = vmatpush.bf16.msra.mxu2 %v1961_v15  ;;  %v2979_v15 = vld [vmem:[#allocation5 + $0x44c] sm:$0xf] }
  0xb6   :  { %1520 = vmatpush.bf16.msra.mxu3 %v2089_v21  ;;  %1482 = vmatmul.bf16.vlgmr.msra.gmra.mxu0 %v3271_v35  ;;  %v2630_v21 = vld [vmem:[#allocation5 + $0x558] sm:$0xf0]  ;;  %v2505_v26 = vor.u32 %v2979_v15, %v2502_v16  ;;  %v3044_v15 = vld [vmem:[#allocation8 + $0x50] sm:$0xff]  ;;  %v3035_v16 = vld [vmem:[#allocation8 + $0x8] sm:$0xff] }
  0xb7   :  { %1526 = vmatpush.bf16.msrb.mxu0 %v2329_v23  ;;  %1495 = vmatmul.bf16.vlgmr.msra.gmra.mxu1 %v3273_v38  ;;  %v2249_v23 = vor.u32 %v2915_v10, %v2246_v11  ;;  %v2633_v31 = vor.u32 %v3011_v17, %v2630_v21  ;;  %v3057_v17 = vld [vmem:[#allocation8 + $0xb8] sm:$0xff] }
  0xb8   :  { %1539 = vmatpush.bf16.msrb.mxu1 %v2457_v24  ;;  %1508 = vmatmul.bf16.vlgmr.msra.gmra.mxu2 %v3261_v19  ;;  %v2662_v19 = vld [vmem:[#allocation5 + $0x598] sm:$0xf0]  ;;  %v1275_v24 = vpop.f32.mrf.mxu0 }
  0xb9   :  { %1552 = vmatpush.bf16.msrb.mxu2 %v2585_v25  ;;  %1521 = vmatmul.bf16.vlgmr.msra.gmra.mxu3 %v3265_v22  ;;  %v2537_v22 = vor.u32 %v2987_v57, %v2534_v58  ;;  %v2665_v1 = vor.u32 %v3019_v59, %v2662_v19  ;;  %v2377_v25 = vor.u32 %v2947_v12, %v2374_v14  ;;  %v3041_v19 = vld [vmem:[#allocation8 + $0x38] sm:$0xff]  ;;  %v3036_v12 = vld [vmem:[#allocation8 + $0x10] sm:$0xff] }
  0xba   :  { %1565 = vmatpush.bf16.msrb.mxu3 %v2713_v29  ;;  %v2943_v29 = vld [vmem:[#allocation5 + $0x32c] sm:$0xf] }
  0xbb   :  { %1527 = vmatpush.bf16.msrb.mxu0 %v2313_v36  ;;  %v3007_v36 = vld [vmem:[#allocation5 + $0x52c] sm:$0xf]  ;;  %v2361_v40 = vor.u32 %v2943_v29, %v2358_v32  ;;  %v3042_v29 = vld [vmem:[#allocation8 + $0x40] sm:$0xff] }
  0xbc   :  { %1540 = vmatpush.bf16.msrb.mxu1 %v2441_v37  ;;  %v2614_v37 = vld [vmem:[#allocation5 + $0x538] sm:$0xf0]  ;;  %v1290_v58 = vpop.f32.mrf.mxu1 }
  0xbd   :  { %1553 = vmatpush.bf16.msrb.mxu2 %v2569_v39  ;;  %v2233_v39 = vor.u32 %v2911_v27, %v2230_v28  ;;  %v2617_v46 = vor.u32 %v3007_v36, %v2614_v37  ;;  %v3034_v27 = vld [vmem:[#allocation8] sm:$0xff]  ;;  %v3055_v36 = vld [vmem:[#allocation8 + $0xa8] sm:$0xff] }
  0xbe   :  { %1566 = vmatpush.bf16.msrb.mxu3 %v2697_v43  ;;  %v2214_v43 = vld [vmem:[#allocation5 + $0x218] sm:$0xf0]  ;;  %v3050_v58 = vld [vmem:[#allocation8 + $0x80] sm:$0xff] }
  0xbf   :  { %1528 = vmatpush.bf16.msrb.mxu0 %v2297_v49  ;;  %v2470_v49 = vld [vmem:[#allocation5 + $0x418] sm:$0xf0]  ;;  %v2217_v53 = vor.u32 %v2907_v42, %v2214_v43 }
  0xc0   :  { %1541 = vmatpush.bf16.msrb.mxu1 %v2425_v50  ;;  %v2473_v57 = vor.u32 %v2971_v48, %v2470_v49 }
  0xc1   :  { %1554 = vmatpush.bf16.msrb.mxu2 %v2553_v51  ;;  %v3003_v51 = vld [vmem:[#allocation5 + $0x50c] sm:$0xf] }
  0xc2   :  { %1567 = vmatpush.bf16.msrb.mxu3 %v2681_v55  ;;  %v1301_v45 = vpop.f32.mrf.mxu2  ;;  %v1277_v55 = vpop.f32.mrf.mxu0  ;;  %v2601_v59 = vor.u32 %v3003_v51, %v2598_v52 }
  0xc3   :  { %1529 = vmatpush.bf16.msrb.mxu0 %v2281_v60  ;;  %v1314_v50 = vpop.f32.mrf.mxu3  ;;  %v277_v60 = vperm.slane %v3291_v54, 0 }
  0xc4   :  { %1542 = vmatpush.bf16.msrb.mxu1 %v2409_v61  ;;  %v3049_v61 = vld [vmem:[#allocation8 + $0x78] sm:$0xff] }
  0xc5   :  { %1555 = vmatpush.bf16.msrb.mxu2 %v2537_v22  ;;  %v1276_v0 = vadd.f32 %v1275_v24, %v277_v60 }
  0xc6   :  { %1568 = vmatpush.bf16.msrb.mxu3 %v2665_v1  ;;  %v3048_v1 = vld [vmem:[#allocation8 + $0x70] sm:$0xff] }
  0xc7   :  { %1530 = vmatpush.bf16.msrb.mxu0 %v2265_v7  ;;  %v1289_v3 = vadd.f32 %v1288_v30, %v1276_v0  ;;  %v278_v30 = vperm.slane %v3291_v54, 1  ;;  %v3063_v0 = vld [vmem:[#allocation8 + $0xe8] sm:$0xff] }
  0xc8   :  { %1543 = vmatpush.bf16.msrb.mxu1 %v2393_v8 }
  0xc9   :  { %1556 = vmatpush.bf16.msrb.mxu2 %v2521_v9  ;;  %v1302_v8 = vadd.f32 %v1301_v45, %v1289_v3  ;;  %v3037_v9 = vld [vmem:[#allocation8 + $0x18] sm:$0xff] }
  0xca   :  { %1569 = vmatpush.bf16.msrb.mxu3 %v2649_v13  ;;  %v1303_v22 = vpop.f32.mrf.mxu2  ;;  %v3053_v45 = vld [vmem:[#allocation8 + $0x98] sm:$0xff] }
  0xcb   :  { %1531 = vmatpush.bf16.msrb.mxu0 %v2249_v23  ;;  %v1316_v63 = vpop.f32.mrf.mxu3  ;;  %v1315_v10 = vadd.f32 %v1314_v50, %v1302_v8  ;;  %v3043_v23 = vld [vmem:[#allocation8 + $0x48] sm:$0xff]  ;;  %v3052_v50 = vld [vmem:[#allocation8 + $0x90] sm:$0xff]  ;;  %v3061_v8 = vld [vmem:[#allocation8 + $0xd8] sm:$0xff] }
  0xcc   :  { %1544 = vmatpush.bf16.msrb.mxu1 %v2377_v25  ;;  %v3056_v25 = vld [vmem:[#allocation8 + $0xb0] sm:$0xff]  ;;  %v279_v63 = vperm.slane %v3291_v54, 2 }
  0xcd   :  { %1557 = vmatpush.bf16.msrb.mxu2 %v2505_v26 }
  0xce   :  { %1570 = vmatpush.bf16.msrb.mxu3 %v2633_v31 }
  0xcf   :  { %1532 = vmatpush.bf16.msrb.mxu0 %v2233_v39 }
  0xd0   :  { %1545 = vmatpush.bf16.msrb.mxu1 %v2361_v40  ;;  %v3054_v40 = vld [vmem:[#allocation8 + $0xa0] sm:$0xff] }
  0xd1   :  { %1558 = vmatpush.bf16.msrb.mxu2 %v2489_v41 }
  0xd2   :  { %1571 = vmatpush.bf16.msrb.mxu3 %v2617_v46 }
  0xd3   :  { %1533 = vmatpush.bf16.msrb.mxu0 %v2217_v53  ;;  %v1327_v5 = vpop.f32.mrf.mxu0 }
  0xd4   :  { %1546 = vmatpush.bf16.msrb.mxu1 %v2345_v56  ;;  %v1340_v7 = vpop.f32.mrf.mxu1  ;;  %v1328_v14 = vadd.f32 %v1327_v5, %v1315_v10  ;;  %v3051_v56 = vld [vmem:[#allocation8 + $0x88] sm:$0xff] }
  0xd5   :  { %1559 = vmatpush.bf16.msrb.mxu2 %v2473_v57 }
  0xd6   :  { %1572 = vmatpush.bf16.msrb.mxu3 %v2601_v59  ;;  %1534 = vmatmul.bf16.vlgmr.msrb.gmra.mxu0 %v3259_v18  ;;  %v3046_v18 = vld [vmem:[#allocation8 + $0x60] sm:$0xff]  ;;  %v1341_v21 = vadd.f32 %v1340_v7, %v1328_v14 }
  0xd7   :  { %1846 = vmatpush.bf16.msra.mxu0 %v3041_v19  ;;  %1547 = vmatmul.bf16.vlgmr.msrb.gmra.mxu1 %v3263_v20  ;;  %v3045_v20 = vld [vmem:[#allocation8 + $0x58] sm:$0xff] }
  0xd8   :  { %1859 = vmatpush.bf16.msra.mxu1 %v3049_v61  ;;  %1560 = vmatmul.bf16.vlgmr.msrb.gmra.mxu2 %v3271_v35  ;;  %v1578_v28 = vmax.f32 %v1341_v21, 0.0  ;;  %v3065_v61 = vld [vmem:[#allocation8 + $0xf8] sm:$0xff] }
  0xd9   :  { %1573 = vmatmul.bf16.vlgmr.msrb.gmra.mxu3 %v3273_v38  ;;  %1872 = vmatpush.bf16.msra.mxu2 %v3057_v17  ;;  %v3058_v17 = vld [vmem:[#allocation8 + $0xc0] sm:$0xff] }
  0xda   :  { %v1582_v31 = vpack.c.bf16 %v1578_v28, %v1578_v28  ;;  %1885 = vmatpush.bf16.msra.mxu3 %v3065_v61 }
  0xdb   :  { %1847 = vmatpush.bf16.msra.mxu0 %v3040_v62  ;;  %v1353_v35 = vpop.f32.mrf.mxu2  ;;  %v1329_v38 = vpop.f32.mrf.mxu0  ;;  %v3064_v62 = vld [vmem:[#allocation8 + $0xf0] sm:$0xff] }
  0xdc   :  { %1860 = vmatpush.bf16.msra.mxu1 %v3048_v1  ;;  %v1366_v11 = vpop.f32.mrf.mxu3  ;;  %v1342_v13 = vpop.f32.mrf.mxu1  ;;  %v1354_v32 = vadd.f32 %v1353_v35, %v278_v30  ;;  %v3059_v38 = vld [vmem:[#allocation8 + $0xc8] sm:$0xff] }
  0xdd   :  { %1873 = vmatpush.bf16.msra.mxu2 %v3056_v25 }
  0xde   :  { %v1367_v33 = vadd.f32 %v1366_v11, %v1354_v32  ;;  %1886 = vmatpush.bf16.msra.mxu3 %v3064_v62 }
  0xdf   :  { %1848 = vmatpush.bf16.msra.mxu0 %v3039_v2 }
  0xe0   :  { %1861 = vmatpush.bf16.msra.mxu1 %v3047_v4  ;;  %v3062_v4 = vld [vmem:[#allocation8 + $0xe0] sm:$0xff] }
  0xe1   :  { %1874 = vmatpush.bf16.msra.mxu2 %v3055_v36 }
  0xe2   :  { %1887 = vmatpush.bf16.msra.mxu3 %v3063_v0 }
  0xe3   :  { %1849 = vmatpush.bf16.msra.mxu0 %v3038_v6  ;;  %v1355_v24 = vpop.f32.mrf.mxu2 }
  0xe4   :  { %1862 = vmatpush.bf16.msra.mxu1 %v3046_v18  ;;  %v1368_v26 = vpop.f32.mrf.mxu3  ;;  %v280_v24 = vperm.slane %v3291_v54, 3  ;;  %v3075_v54 = vld [vmem:[%s3311_s4] ss:$0 sm:$0xff]  ;;  %s3216_s4 = smov [#allocation10]  }
  0xe5   :  { %1875 = vmatpush.bf16.msra.mxu2 %v3054_v40  ;;  %s1932_s15 = sshll.u32 %s3216_s4, 4  ;;  %s1933_s15 = int_to_ptr.vmem [resolvable:$true] %s1932_s15 }
  0xe6   :  { %1888 = vmatpush.bf16.msra.mxu3 %v3062_v4 }
  0xe7   :  { %1850 = vmatpush.bf16.msra.mxu0 %v3037_v9  ;;  %v3060_v9 = vld [vmem:[#allocation8 + $0xd0] sm:$0xff] }
  0xe8   :  { %1863 = vmatpush.bf16.msra.mxu1 %v3045_v20 }
  0xe9   :  { %1876 = vmatpush.bf16.msra.mxu2 %v3053_v45 }
  0xea   :  { %1889 = vmatpush.bf16.msra.mxu3 %v3061_v8 }
  0xeb   :  { %1851 = vmatpush.bf16.msra.mxu0 %v3036_v12 }
  0xec   :  { %1864 = vmatpush.bf16.msra.mxu1 %v3044_v15 }
  0xed   :  { %1877 = vmatpush.bf16.msra.mxu2 %v3052_v50 }
  0xee   :  { %1890 = vmatpush.bf16.msra.mxu3 %v3060_v9 }
  0xef   :  { %1852 = vmatpush.bf16.msra.mxu0 %v3035_v16 }
  0xf0   :  { %1865 = vmatpush.bf16.msra.mxu1 %v3043_v23 }
  0xf1   :  { %1878 = vmatpush.bf16.msra.mxu2 %v3051_v56 }
  0xf2   :  { %1891 = vmatpush.bf16.msra.mxu3 %v3059_v38 }
  0xf3   :  { %1853 = vmatpush.bf16.msra.mxu0 %v3034_v27  ;;  %v1379_v34 = vpop.f32.mrf.mxu0 }
  0xf4   :  { %1866 = vmatpush.bf16.msra.mxu1 %v3042_v29  ;;  %v1380_v37 = vadd.f32 %v1379_v34, %v1367_v33  ;;  %v1392_v39 = vpop.f32.mrf.mxu1 }
  0xf5   :  { %1879 = vmatpush.bf16.msra.mxu2 %v3050_v58 }
  0xf6   :  { %1854 = vmatmul.bf16.vlgmr.msra.gmra.mxu0 %v1582_v31  ;;  %v1393_v41 = vadd.f32 %v1392_v39, %v1380_v37  ;;  %1892 = vmatpush.bf16.msra.mxu3 %v3058_v17 }
  0xfb   :  { %v1405_v42 = vpop.f32.mrf.mxu2  ;;  %v1381_v47 = vpop.f32.mrf.mxu0 }
  0xfc   :  { %v1406_v43 = vadd.f32 %v1405_v42, %v1393_v41  ;;  %v1418_v44 = vpop.f32.mrf.mxu3  ;;  %v1394_v48 = vpop.f32.mrf.mxu1 }
  0xfe   :  { %v1419_v46 = vadd.f32 %v1418_v44, %v1406_v43 }
 0x100   :  { %v1579_v49 = vmax.f32 %v1419_v46, 0.0 }
 0x102   :  { %v1583_v51 = vpack.c.bf16 %v1579_v49, %v1579_v49 }
 0x103   :  { %v1407_v52 = vpop.f32.mrf.mxu2 }
 0x104   :  { %1867 = vmatmul.bf16.vlgmr.msra.gmra.mxu1 %v1583_v51  ;;  %v1420_v53 = vpop.f32.mrf.mxu3  ;;  %v1898_v51 = vlaneseq }
 0x106   :  { %v1899_v52 = vand.u32 127, %v1898_v51 }
 0x108   :  { %vm1900_vm0 = vcmp.lt.s32.totalorder %v1899_v52, 2 }
 0x113   :  { %v1431_v55 = vpop.f32.mrf.mxu0 }
 0x114   :  { %v1444_v57 = vpop.f32.mrf.mxu1  ;;  %v1432_v1 = vadd.f32 %v1431_v55, %v279_v63 }
 0x116   :  { %v1445_v5 = vadd.f32 %v1444_v57, %v1432_v1 }
 0x11b   :  { %v1457_v59 = vpop.f32.mrf.mxu2  ;;  %v1433_v19 = vpop.f32.mrf.mxu0 }
 0x11c   :  { %v1470_v60 = vpop.f32.mrf.mxu3  ;;  %v1446_v22 = vpop.f32.mrf.mxu1  ;;  %v1458_v6 = vadd.f32 %v1457_v59, %v1445_v5 }
 0x11e   :  { %v1471_v7 = vadd.f32 %v1470_v60, %v1458_v6 }
 0x123   :  { %v1459_v2 = vpop.f32.mrf.mxu2 }
 0x124   :  { %v1472_v3 = vpop.f32.mrf.mxu3 }
 0x133   :  { %v1483_v18 = vpop.f32.mrf.mxu0 }
 0x134   :  { %v1484_v10 = vadd.f32 %v1483_v18, %v1471_v7  ;;  %v1496_v20 = vpop.f32.mrf.mxu1 }
 0x136   :  { %v1497_v35 = vadd.f32 %v1496_v20, %v1484_v10 }
 0x138   :  { %v1580_v11 = vmax.f32 %v1497_v35, 0.0 }
 0x13a   :  { %v1584_v12 = vpack.c.bf16 %v1580_v11, %v1580_v11 }
 0x13b   :  { %v1509_v13 = vpop.f32.mrf.mxu2  ;;  %v1485_v15 = vpop.f32.mrf.mxu0 }
 0x13c   :  { %v1522_v14 = vpop.f32.mrf.mxu3  ;;  %1880 = vmatmul.bf16.vlgmr.msra.gmra.mxu2 %v1584_v12  ;;  %v1498_v16 = vpop.f32.mrf.mxu1  ;;  %v1510_v25 = vadd.f32 %v1509_v13, %v280_v24 }
 0x13e   :  { %v1523_v26 = vadd.f32 %v1522_v14, %v1510_v25 }
 0x143   :  { %v1511_v21 = vpop.f32.mrf.mxu2 }
 0x144   :  { %v1524_v23 = vpop.f32.mrf.mxu3 }
 0x153   :  { %v1535_v27 = vpop.f32.mrf.mxu0 }
 0x154   :  { %v1548_v28 = vpop.f32.mrf.mxu1  ;;  %v1536_v29 = vadd.f32 %v1535_v27, %v1523_v26 }
 0x156   :  { %v1549_v30 = vadd.f32 %v1548_v28, %v1536_v29 }
 0x15b   :  { %v1561_v31 = vpop.f32.mrf.mxu2  ;;  %v1537_v34 = vpop.f32.mrf.mxu0 }
 0x15c   :  { %v1562_v32 = vadd.f32 %v1561_v31, %v1549_v30  ;;  %v1574_v33 = vpop.f32.mrf.mxu3  ;;  %v1550_v36 = vpop.f32.mrf.mxu1 }
 0x15e   :  { %v1575_v37 = vadd.f32 %v1574_v33, %v1562_v32 }
 0x160   :  { %v1581_v39 = vmax.f32 %v1575_v37, 0.0 }
 0x162   :  { %v1585_v40 = vpack.c.bf16 %v1581_v39, %v1581_v39 }
 0x163   :  { %v1563_v41 = vpop.f32.mrf.mxu2 }
 0x164   :  { %v1576_v42 = vpop.f32.mrf.mxu3  ;;  %1893 = vmatmul.bf16.vlgmr.msra.gmra.mxu3 %v1585_v40 }
 0x173   :  { %v1855_v43 = vpop.f32.mrf.mxu0 }
 0x174   :  { %v1856_v45 = vadd.f32 %v3075_v54, %v1855_v43 }
 0x17b   :  { %v1857_v44 = vpop.f32.mrf.mxu0 }
 0x181   :  { %v1868_v46 = vpop.f32.mrf.mxu1 }
 0x182   :  { %v1869_v47 = vadd.f32 %v1868_v46, %v1856_v45 }
 0x189   :  { %v1870_v48 = vpop.f32.mrf.mxu1 }
 0x1bf   :  { %v1881_v49 = vpop.f32.mrf.mxu2 }
 0x1c0   :  { %v1882_v53 = vadd.f32 %v1881_v49, %v1869_v47 }
 0x1c7   :  { %v1883_v50 = vpop.f32.mrf.mxu2 }
 0x1e7   :  { %v1894_v55 = vpop.f32.mrf.mxu3 }
 0x1e8   :  { %v1895_v56 = vadd.f32 %v1894_v55, %v1882_v53 }
 0x1ea   :  { %v1901_v57 = vsel %vm1900_vm0, %v1895_v56, -inf }
 0x1eb   :  { %1902 = vmax.xlane.f32.xlu0 %v1901_v57 }
 0x1ef   :  { %v1896_v58 = vpop.f32.mrf.mxu3 }
 0x25e   :  { %v1903_v59 = vpop.xlane.xlu0 %1902 }
 0x25f   :  { %v1904_v19 = vsub.f32 %v1901_v57, %v1903_v59 }
 0x261   :  { %v1905_v60 = vmul.f32 1.442695, %v1904_v19 }
 0x263   :  { %3076 = vpow2.f32 %v1905_v60 }
 0x269   :  { %v3077_v61 = vpop.eup %3076 }
 0x26a   :  { %v1907_v22 = vsel %vm1900_vm0, %v3077_v61, 0.0 }
 0x26b   :  { %1908 = vadd.xlane.f32.xlu0 %v1907_v22 }
 0x2de   :  { %v1909_v62 = vpop.xlane.xlu0 %1908 }
 0x2df   :  { %3078 = vrcp.f32 %v1909_v62  ;;  %v1921_v2 = vand.u32 2147483648, %v1909_v62  ;;  %v1919_v4 = vand.u32 2147483647, %v1909_v62  ;;  %vm1915_vm2 = vweird.f32 %v1909_v62 }
 0x2e1   :  { %v1922_v6 = vor.u32 1.1754944e-38, %v1921_v2  ;;  %vm1920_vm4 = vcmp.eq.f32.partialorder %v1919_v4, 8.507059e+37 }
 0x2e5   :  { %v3079_v63 = vpop.eup %3078 }
 0x2e6   :  { %v1911_v0 = vmul.f32 %v3079_v63, %v1909_v62  ;;  %vm1916_vm1 = vweird.f32 %v3079_v63 }
 0x2e7   :  { %vm1917_vm3 = vmor %vm1915_vm2, %vm1916_vm1 }
 0x2e8   :  { %v1912_v1 = vsub.f32 1.0, %v1911_v0 }
 0x2ea   :  { %v1913_v3 = vmul.f32 %v3079_v63, %v1912_v1 }
 0x2ec   :  { %v1914_v5 = vadd.f32 %v3079_v63, %v1913_v3 }
 0x2ee   :  { %v1918_v7 = vsel %vm1917_vm3, %v3079_v63, %v1914_v5 }
 0x2ef   :  { %v1923_v8 = vsel %vm1920_vm4, %v1922_v6, %v1918_v7 }
 0x2f0   :  { %v1924_v18 = vmul.f32 %v1923_v8, %v1907_v22 }
 0x2f2   :  { %v1925_v9 = vpack.c.bf16 %v1924_v18, %v1924_v18 }
 0x2f4   :  { %1926 = vst [vmem:[#allocation10] sm:$0xf] %v1925_v9 }
 0x2f5   :  { %1937 = dma.vmem_to_hbm [thread:$0]  %s1933_s15, 64, %s1935_s18, [#allocation4]  }
 0x2f6   :  { %3206 = dma.done.wait [#allocation4], 64  }
 0x2f7   :  { %3207 = vsyncadd [#allocation4], 4294967232 }
 0x2f8   :  { %1942 = vsyncpa [#allocation3], 1 }
 0x2f9   :  { %1943 = vsyncpa [#allocation6], 1 }
 0x2fa   :  { %1944 = vsyncpa [#allocation9], 1 }
 0x2fb   :  { %1945 = vsyncpa [#allocation4], 1 }

</bundles_post_ra>
